<compile_context>
chip_gen: v5e
topology: v5e:2x2
jax: 0.10.0
libtpu: 0.0.40
codegen_flags: <defaults>
</compile_context>

<pallas_src>
import jax
import jax.numpy as jnp
from jax.experimental import pallas as pl
from jax.experimental.pallas import tpu as pltpu


def _round_up(x, m):
    return ((x + m - 1) // m) * m


def char_cnn_kernel(ids_ref, keep_ref, ew_ref, b_ref, nmask_ref, out_ref):
    TB = ids_ref.shape[0]
    K, Vp, Fp = ew_ref.shape
    Tout_p = nmask_ref.shape[0]

    # One-hot lane grid, built once (hoisted out of the tap loop).
    iota_v = jax.lax.broadcasted_iota(jnp.int32, (TB, Tout_p, Vp), 2)

    # K fused taps: each is a single full-128 contraction MXU matmul, f32 accumulation.
    # The sentinel id (-1) at padding positions gives an all-zero one-hot row, which is
    # exactly the Conv1d zero padding.
    acc = jnp.zeros((TB * Tout_p, Fp), jnp.float32)
    for j in range(K):                                        # K is small & static
        ids_j = ids_ref[:, j:j + Tout_p, :]                   # [TB, Tout_p, 1] int32
        onehot = (iota_v == ids_j).astype(ew_ref.dtype)       # [TB, Tout_p, Vp]
        acc = acc + jnp.dot(onehot.reshape(TB * Tout_p, Vp), ew_ref[j],
                            preferred_element_type=jnp.float32)

    # Mask fused positions that are not real outputs of a given conv (and the Tout->Tout_p
    # alignment padding), then global max-pool over time.
    pre = acc.reshape(TB, Tout_p, Fp) + nmask_ref[...][None, :, :]
    pooled = jnp.max(pre, axis=1)                             # [TB, Fp]

    # tanh is monotonic and the bias is per-channel, so both commute with the max.
    result = jnp.tanh(pooled + b_ref[...])                    # [TB, Fp]
    out_ref[...] = (result * keep_ref[...]).astype(out_ref.dtype)   # dense (TB, Fp) store


def character_cnn_forward(ids, mask, emb, conv_ws, conv_bs, *, batch_tile=None,
                          compute_dtype=jnp.bfloat16):
    """
    ids:      [B, L] integer token indices (values must be < vocab size)
    mask:     [B] or None; rows with mask == 0 produce all-zero outputs
    emb:      [V, E] embedding table
    conv_ws:  list of [F, E, k] Conv1d weights (PyTorch layout), padding = k - 1
    conv_bs:  list of [F] Conv1d biases
    compute_dtype: matmul operand dtype (bfloat16 = MXU-rate path, float32 = exact)
    returns:  [B, F * len(conv_ws)] float32
    """
    B, L = ids.shape
    V, E = emb.shape
    F = int(conv_ws[0].shape[0])
    ks = [int(w.shape[2]) for w in conv_ws]
    K = max(ks)
    F_total = F * len(conv_ws)

    Vp = _round_up(V, 128)
    Fp = _round_up(F_total, 128)
    Tout = L + K - 1                      # fused (max-k) conv output length
    Tout_p = _round_up(Tout, 8)           # sublane aligned -> layout-preserving reshapes
    Tpad_p = Tout_p + K - 1               # padded-ids length covering the K static shifts

    # ---- batch tiling: big tiles, B padded up to a tile multiple (no TB=1 fallback) ----
    if batch_tile is None:
        batch_tile = 128
    TB = max(8, _round_up(min(batch_tile, _round_up(B, 8)), 8))
    itemsize = jnp.dtype(compute_dtype).itemsize
    per_example = Tout_p * (Fp * 4 + Vp * itemsize) + 2 * Fp * 4 + Tpad_p * 4
    while TB > 8 and TB * per_example > 20 * 1024 * 1024:     # stay under scoped VMEM
        TB -= 8
    Bp = _round_up(B, TB)
    grid = (Bp // TB,)

    # ---- host/XLA-side static packing (one-off, exact f32 math) ----
    # EW[j] = emb @ W_tap_j; taps j >= k of conv c stay zero.
    emb_f32 = emb.astype(jnp.float32)
    EW = jnp.zeros((K, Vp, Fp), jnp.float32)
    b_fused = jnp.zeros((1, Fp), jnp.float32)
    nmask = jnp.zeros((Tout_p, Fp), jnp.float32)
    NEG = jnp.float32(-1e30)
    for c, k in enumerate(ks):
        wc = conv_ws[c].astype(jnp.float32)                        # [F, E, k]
        for j in range(k):
            ew_j = jnp.dot(emb_f32, wc[:, :, j].T,
                           precision=jax.lax.Precision.HIGHEST)    # [V, F]
            EW = EW.at[j, :V, c * F:(c + 1) * F].set(ew_j)
        b_fused = b_fused.at[0, c * F:(c + 1) * F].set(conv_bs[c].astype(jnp.float32))
        if K - k > 0:
            # fused positions t < K-k are not real outputs of conv c -> exclude from max
            nmask = nmask.at[:K - k, c * F:(c + 1) * F].set(NEG)
    if Tout_p > Tout:
        nmask = nmask.at[Tout:, :].set(NEG)                        # alignment pad rows
    EW = EW.astype(compute_dtype)

    # Padded ids: sentinel -1 -> all-zero one-hot row == Conv1d zero padding.
    # TODO(synk): ids >= V (but < Vp) silently map to a zero embedding row; PyTorch's
    # nn.Embedding would raise on such indices.
    ids_pad = jnp.full((Bp, Tpad_p, 1), -1, jnp.int32)
    ids_pad = ids_pad.at[:B, K - 1:K - 1 + L, 0].set(ids.astype(jnp.int32))

    if mask is None:
        keep_b = jnp.ones((B,), jnp.float32)
    else:
        keep_b = (mask != 0).astype(jnp.float32)
    keep = jnp.zeros((Bp, 1), jnp.float32).at[:B, 0].set(keep_b)

    out_p = pl.pallas_call(
        char_cnn_kernel,
        out_shape=jax.ShapeDtypeStruct((Bp, Fp), jnp.float32),
        grid=grid,
        in_specs=[
            pl.BlockSpec((TB, Tpad_p, 1), lambda i: (i, 0, 0)),    # padded token ids
            pl.BlockSpec((TB, 1), lambda i: (i, 0)),               # keep mask
            pl.BlockSpec((K, Vp, Fp), lambda i: (0, 0, 0)),        # fused emb @ conv taps
            pl.BlockSpec((1, Fp), lambda i: (0, 0)),               # fused bias
            pl.BlockSpec((Tout_p, Fp), lambda i: (0, 0)),          # validity mask
        ],
        out_specs=pl.BlockSpec((TB, Fp), lambda i: (i, 0)),        # dense output block
        compiler_params=pltpu.CompilerParams(
            dimension_semantics=("parallel",),
            vmem_limit_bytes=32 * 1024 * 1024),
    )(ids_pad, keep, EW, b_fused, nmask)

    return out_p[:B, :F_total]


def character_cnn_ref(ids, mask, emb, conv_ws, conv_bs):
    """Pure-JAX reference of Character_CNN.forward (tanh -> max-pool -> concat)."""
    x = emb[ids]                                                   # [B, L, E]
    B, L, _ = x.shape
    outs = []
    for wc, bc in zip(conv_ws, conv_bs):                           # wc: [F, E, k]
        k = wc.shape[2]
        xp = jnp.pad(x, ((0, 0), (k - 1, k - 1), (0, 0)))
        T = L + k - 1
        conv = sum(jnp.einsum("ble,fe->blf", xp[:, j:j + T, :], wc[:, :, j],
                              precision="highest") for j in range(k)) + bc
        outs.append(jnp.max(jnp.tanh(conv), axis=1))
    out = jnp.concatenate(outs, axis=1)
    if mask is not None:
        out = out * (mask != 0).astype(out.dtype)[:, None]
    return out


if __name__ == "__main__":
    B, L = 4, 16
    vocab_size, embed_dim = 100, 32
    num_filters, filter_sizes = 32, (2, 3, 4)

    key = jax.random.PRNGKey(0)
    keys = jax.random.split(key, 2 + 2 * len(filter_sizes))
    k_ids, k_emb, k_w = keys[0], keys[1], keys[2:]

    ids = jax.random.randint(k_ids, (B, L), 0, vocab_size, dtype=jnp.int32)
    # per-example mask; last example has mask == 0 to exercise the masked path
    mask = jnp.array([3.0, 1.0, 2.0, 0.0], jnp.float32)

    emb = jax.random.normal(k_emb, (vocab_size, embed_dim), jnp.float32)
    conv_ws, conv_bs = [], []
    for i, k in enumerate(filter_sizes):
        lim = 1.0 / (embed_dim * k) ** 0.5        # PyTorch Conv1d default init bound
        conv_ws.append(jax.random.uniform(k_w[2 * i], (num_filters, embed_dim, k),
                                          jnp.float32, -lim, lim))
        conv_bs.append(jax.random.uniform(k_w[2 * i + 1], (num_filters,),
                                          jnp.float32, -lim, lim))

    expected = character_cnn_ref(ids, mask, emb, conv_ws, conv_bs)

    # float32 operands: matches the reference tightly.
    out_f32 = character_cnn_forward(ids, mask, emb, conv_ws, conv_bs,
                                    compute_dtype=jnp.float32)
    jax.block_until_ready(out_f32)
    assert out_f32.shape == (B, num_filters * len(filter_sizes)), out_f32.shape
    err_f32 = float(jnp.max(jnp.abs(out_f32 - expected)))
    assert jnp.allclose(out_f32, expected, atol=1e-4, rtol=1e-4), err_f32

    # bfloat16 operands (default, MXU-rate path): one-hot is exact, only EW rounding.
    out_bf16 = character_cnn_forward(ids, mask, emb, conv_ws, conv_bs)
    jax.block_until_ready(out_bf16)
    assert out_bf16.shape == (B, num_filters * len(filter_sizes)), out_bf16.shape
    err_bf16 = float(jnp.max(jnp.abs(out_bf16 - expected)))
    assert jnp.allclose(out_bf16, expected, atol=2e-2, rtol=2e-2), err_bf16

    print("KERNEL_OK")
</pallas_src>

<mosaic_0001>
module attributes {stable_mosaic.version = 11 : i64} {
  func.func @char_cnn_kernel(%arg0: i32, %arg1: memref<8x27x1xi32, #tpu.memory_space<vmem>>, %arg2: memref<8x1xf32, #tpu.memory_space<vmem>>, %arg3: memref<4x128x128xf32, #tpu.memory_space<vmem>>, %arg4: memref<1x128xf32, #tpu.memory_space<vmem>>, %arg5: memref<24x128xf32, #tpu.memory_space<vmem>>, %arg6: memref<8x128xf32, #tpu.memory_space<vmem>>) attributes {dimension_semantics = [#tpu.dimension_semantics<parallel>], iteration_bounds = array<i64: 1>, scalar_prefetch = 0 : i64, scratch_operands = 0 : i64, tpu.core_type = #tpu.core_type<tc>, window_params = [{transform_indices = @transform_0, window_bounds = array<i64: 8, 27, 1>}, {transform_indices = @transform_1, window_bounds = array<i64: 8, 1>}, {pipeline_mode = #tpu.pipeline_mode<synchronous>, transform_indices = @transform_2, window_bounds = array<i64: 4, 128, 128>}, {pipeline_mode = #tpu.pipeline_mode<synchronous>, transform_indices = @transform_3, window_bounds = array<i64: 1, 128>}, {pipeline_mode = #tpu.pipeline_mode<synchronous>, transform_indices = @transform_4, window_bounds = array<i64: 24, 128>}, {transform_indices = @transform_5, window_bounds = array<i64: 8, 128>}]} {
    %0 = tpu.iota {dimensions = array<i32: 2>} : vector<8x24x128xi32>
    %cst = arith.constant 0.000000e+00 : f32
    %1 = vector.broadcast %cst : f32 to vector<192x128xf32>
    %c0 = arith.constant 0 : index
    %c0_0 = arith.constant 0 : index
    %c0_1 = arith.constant 0 : index
    %2 = vector.load %arg1[%c0, %c0_0, %c0_1] : memref<8x27x1xi32, #tpu.memory_space<vmem>>, vector<8x24x1xi32>
    %3 = vector.broadcast %2 : vector<8x24x1xi32> to vector<8x24x128xi32>
    %4 = arith.cmpi eq, %0, %3 : vector<8x24x128xi32>
    %5 = arith.extui %4 : vector<8x24x128xi1> to vector<8x24x128xi32>
    %6 = arith.sitofp %5 : vector<8x24x128xi32> to vector<8x24x128xf32>
    %7 = vector.shape_cast %6 : vector<8x24x128xf32> to vector<192x128xf32>
    %c0_2 = arith.constant 0 : index
    %c0_3 = arith.constant 0 : index
    %c0_4 = arith.constant 0 : index
    %8 = vector.load %arg3[%c0_2, %c0_3, %c0_4] : memref<4x128x128xf32, #tpu.memory_space<vmem>>, vector<1x128x128xf32>
    %9 = vector.shape_cast %8 : vector<1x128x128xf32> to vector<128x128xf32>
    %cst_5 = arith.constant dense<0.000000e+00> : vector<192x128xf32>
    %10 = tpu.matmul %7, %9, %cst_5 {dimension_numbers = #tpu.dot_dimension_numbers<[1], [0], [0], [1], [0, 0, 1, 1], [], []>} : vector<192x128xf32>, vector<128x128xf32>, vector<192x128xf32> -> vector<192x128xf32>
    %11 = arith.addf %1, %10 : vector<192x128xf32>
    %c0_6 = arith.constant 0 : index
    %c1 = arith.constant 1 : index
    %c0_7 = arith.constant 0 : index
    %12 = vector.load %arg1[%c0_6, %c1, %c0_7] : memref<8x27x1xi32, #tpu.memory_space<vmem>>, vector<8x24x1xi32>
    %13 = vector.broadcast %12 : vector<8x24x1xi32> to vector<8x24x128xi32>
    %14 = arith.cmpi eq, %0, %13 : vector<8x24x128xi32>
    %15 = arith.extui %14 : vector<8x24x128xi1> to vector<8x24x128xi32>
    %16 = arith.sitofp %15 : vector<8x24x128xi32> to vector<8x24x128xf32>
    %17 = vector.shape_cast %16 : vector<8x24x128xf32> to vector<192x128xf32>
    %c1_8 = arith.constant 1 : index
    %c0_9 = arith.constant 0 : index
    %c0_10 = arith.constant 0 : index
    %18 = vector.load %arg3[%c1_8, %c0_9, %c0_10] : memref<4x128x128xf32, #tpu.memory_space<vmem>>, vector<1x128x128xf32>
    %19 = vector.shape_cast %18 : vector<1x128x128xf32> to vector<128x128xf32>
    %cst_11 = arith.constant dense<0.000000e+00> : vector<192x128xf32>
    %20 = tpu.matmul %17, %19, %cst_11 {dimension_numbers = #tpu.dot_dimension_numbers<[1], [0], [0], [1], [0, 0, 1, 1], [], []>} : vector<192x128xf32>, vector<128x128xf32>, vector<192x128xf32> -> vector<192x128xf32>
    %21 = arith.addf %11, %20 : vector<192x128xf32>
    %c0_12 = arith.constant 0 : index
    %c2 = arith.constant 2 : index
    %c0_13 = arith.constant 0 : index
    %22 = vector.load %arg1[%c0_12, %c2, %c0_13] : memref<8x27x1xi32, #tpu.memory_space<vmem>>, vector<8x24x1xi32>
    %23 = vector.broadcast %22 : vector<8x24x1xi32> to vector<8x24x128xi32>
    %24 = arith.cmpi eq, %0, %23 : vector<8x24x128xi32>
    %25 = arith.extui %24 : vector<8x24x128xi1> to vector<8x24x128xi32>
    %26 = arith.sitofp %25 : vector<8x24x128xi32> to vector<8x24x128xf32>
    %27 = vector.shape_cast %26 : vector<8x24x128xf32> to vector<192x128xf32>
    %c2_14 = arith.constant 2 : index
    %c0_15 = arith.constant 0 : index
    %c0_16 = arith.constant 0 : index
    %28 = vector.load %arg3[%c2_14, %c0_15, %c0_16] : memref<4x128x128xf32, #tpu.memory_space<vmem>>, vector<1x128x128xf32>
    %29 = vector.shape_cast %28 : vector<1x128x128xf32> to vector<128x128xf32>
    %cst_17 = arith.constant dense<0.000000e+00> : vector<192x128xf32>
    %30 = tpu.matmul %27, %29, %cst_17 {dimension_numbers = #tpu.dot_dimension_numbers<[1], [0], [0], [1], [0, 0, 1, 1], [], []>} : vector<192x128xf32>, vector<128x128xf32>, vector<192x128xf32> -> vector<192x128xf32>
    %31 = arith.addf %21, %30 : vector<192x128xf32>
    %c0_18 = arith.constant 0 : index
    %c3 = arith.constant 3 : index
    %c0_19 = arith.constant 0 : index
    %32 = vector.load %arg1[%c0_18, %c3, %c0_19] : memref<8x27x1xi32, #tpu.memory_space<vmem>>, vector<8x24x1xi32>
    %33 = vector.broadcast %32 : vector<8x24x1xi32> to vector<8x24x128xi32>
    %34 = arith.cmpi eq, %0, %33 : vector<8x24x128xi32>
    %35 = arith.extui %34 : vector<8x24x128xi1> to vector<8x24x128xi32>
    %36 = arith.sitofp %35 : vector<8x24x128xi32> to vector<8x24x128xf32>
    %37 = vector.shape_cast %36 : vector<8x24x128xf32> to vector<192x128xf32>
    %c3_20 = arith.constant 3 : index
    %c0_21 = arith.constant 0 : index
    %c0_22 = arith.constant 0 : index
    %38 = vector.load %arg3[%c3_20, %c0_21, %c0_22] : memref<4x128x128xf32, #tpu.memory_space<vmem>>, vector<1x128x128xf32>
    %39 = vector.shape_cast %38 : vector<1x128x128xf32> to vector<128x128xf32>
    %cst_23 = arith.constant dense<0.000000e+00> : vector<192x128xf32>
    %40 = tpu.matmul %37, %39, %cst_23 {dimension_numbers = #tpu.dot_dimension_numbers<[1], [0], [0], [1], [0, 0, 1, 1], [], []>} : vector<192x128xf32>, vector<128x128xf32>, vector<192x128xf32> -> vector<192x128xf32>
    %41 = arith.addf %31, %40 : vector<192x128xf32>
    %42 = vector.shape_cast %41 : vector<192x128xf32> to vector<8x24x128xf32>
    %c0_24 = arith.constant 0 : index
    %c0_25 = arith.constant 0 : index
    %43 = vector.load %arg5[%c0_24, %c0_25] : memref<24x128xf32, #tpu.memory_space<vmem>>, vector<24x128xf32>
    %44 = vector.shape_cast %43 : vector<24x128xf32> to vector<1x24x128xf32>
    %45 = vector.broadcast %44 : vector<1x24x128xf32> to vector<8x24x128xf32>
    %46 = arith.addf %42, %45 : vector<8x24x128xf32>
    %cst_26 = arith.constant dense<0xFF800000> : vector<8x128xf32>
    %47 = vector.multi_reduction <maximumf>, %46, %cst_26 [1] : vector<8x24x128xf32> to vector<8x128xf32>
    %c0_27 = arith.constant 0 : index
    %c0_28 = arith.constant 0 : index
    %48 = vector.load %arg4[%c0_27, %c0_28] : memref<1x128xf32, #tpu.memory_space<vmem>>, vector<1x128xf32>
    %49 = vector.broadcast %48 : vector<1x128xf32> to vector<8x128xf32>
    %50 = arith.addf %47, %49 : vector<8x128xf32>
    %51 = math.tanh %50 : vector<8x128xf32>
    %c0_29 = arith.constant 0 : index
    %c0_30 = arith.constant 0 : index
    %52 = vector.load %arg2[%c0_29, %c0_30] : memref<8x1xf32, #tpu.memory_space<vmem>>, vector<8x1xf32>
    %53 = vector.broadcast %52 : vector<8x1xf32> to vector<8x128xf32>
    %54 = arith.mulf %51, %53 : vector<8x128xf32>
    %c0_31 = arith.constant 0 : index
    %c0_32 = arith.constant 0 : index
    %55 = vector.load %arg6[%c0_31, %c0_32] : memref<8x128xf32, #tpu.memory_space<vmem>>, vector<8x128xf32>
    tpu.vector_store %arg6[%c0_31, %c0_32], %54 {strides = array<i32>} : memref<8x128xf32, #tpu.memory_space<vmem>>, vector<8x128xf32>,
    return
  }
  func.func @transform_0(%arg0: i32) -> (i32, i32, i32) {
    %c0_i32 = arith.constant 0 : i32
    %c0_i32_0 = arith.constant 0 : i32
    %c0_i32_1 = arith.constant 0 : i32
    return %arg0, %c0_i32, %c0_i32_0 : i32, i32, i32
  }
  func.func @transform_1(%arg0: i32) -> (i32, i32) {
    %c0_i32 = arith.constant 0 : i32
    %c0_i32_0 = arith.constant 0 : i32
    return %arg0, %c0_i32 : i32, i32
  }
  func.func @transform_2(%arg0: i32) -> (i32, i32, i32) {
    %c0_i32 = arith.constant 0 : i32
    %c0_i32_0 = arith.constant 0 : i32
    %c0_i32_1 = arith.constant 0 : i32
    %c0_i32_2 = arith.constant 0 : i32
    return %c0_i32, %c0_i32_0, %c0_i32_1 : i32, i32, i32
  }
  func.func @transform_3(%arg0: i32) -> (i32, i32) {
    %c0_i32 = arith.constant 0 : i32
    %c0_i32_0 = arith.constant 0 : i32
    %c0_i32_1 = arith.constant 0 : i32
    return %c0_i32, %c0_i32_0 : i32, i32
  }
  func.func @transform_4(%arg0: i32) -> (i32, i32) {
    %c0_i32 = arith.constant 0 : i32
    %c0_i32_0 = arith.constant 0 : i32
    %c0_i32_1 = arith.constant 0 : i32
    return %c0_i32, %c0_i32_0 : i32, i32
  }
  func.func @transform_5(%arg0: i32) -> (i32, i32) {
    %c0_i32 = arith.constant 0 : i32
    %c0_i32_0 = arith.constant 0 : i32
    return %arg0, %c0_i32 : i32, i32
  }
}

</mosaic_0001>

<bundles_post_ra>
// kernel: tpu_custom_call.1
= control target key start
LH: loop header
LB: loop body
LE: loop exit
PB: predicated region body
PF: predicated region fallthrough
CT: control target
= control target key end

     0   :  { %10 = vsyncpa [#allocation3], 0  ;;  %s2321_s0 = inlined_call_operand.vmem [shape: s32[8,27,1], index: 0, kind: input, shape index: {}]   ;;  %s2322_s1 = inlined_call_operand.vmem [shape: f32[8,1], index: 1, kind: input, shape index: {}]   ;;  %s2323_s2 = inlined_call_operand.hbm [shape: f32[4,128,128], index: 2, kind: input, shape index: {}]   ;;  %s2324_s3 = inlined_call_operand.vmem [shape: f32[1,128], index: 3, kind: input, shape index: {}]   ;;  %s2325_s4 = inlined_call_operand.vmem [shape: f32[24,128], index: 4, kind: input, shape index: {}]   ;;  %s2326_s5 = inlined_call_operand.hbm [shape: f32[8,128], index: 5, kind: output, shape index: {}]  }
   0x1   :  { %11 = vsyncpa [#allocation4], 0  ;;  %s20_s20 = sshll.u32 %s2323_s2, 4  ;;  %s1639_s21 = smov [#allocation2]   ;;  %s21_s20 = int_to_ptr.hbm [resolvable:$true] %s20_s20 }
   0x2   :  { %s22_s22 = sshll.u32 %s1639_s21, 4  ;;  %s1640_s23 = smov 128   ;;  %s23_s22 = int_to_ptr.vmem [resolvable:$true] %s22_s22 }
   0x3   :  { %s1641_s24 = smov 8  }
   0x4   :  { %28 = dma.hbm_to_vmem [thread:$0]  %s21_s20, 8192, %s23_s22, [#allocation3], %s1640_s23, %s1640_s23, %s1641_s24  }
   0x5   :  { %1635 = dma.done.wait [#allocation3], 8192  }
   0x6   :  { %1636 = vsyncadd [#allocation3], 4294959104  ;;  %v1642_v0 = vmov 0   ;;  %v43_v1 = vld [vmem:[%s2321_s0 + $0x28] sm:$0xff]  ;;  %v41_v2 = vld [vmem:[%s2321_s0 + $0x10] sm:$0xff]  ;;  %v37_v62 = vlaneseq  ;;  %s1359_s19 = sshll.u32 %s2326_s5, 4  ;;  %s1360_s19 = int_to_ptr.hbm [resolvable:$true] %s1359_s19 }
   0x7   :  { %1569 = vset.pattern.permute.xlu2 %v1642_v0  ;;  %1568 = vset.pattern.permute.xlu1 %v1642_v0  ;;  %v39_v3 = vld [vmem:[%s2321_s0] sm:$0xff]  ;;  %v44_v4 = vld [vmem:[%s2321_s0 + $0x30] sm:$0xff]  ;;  %v40_v6 = vld [vmem:[%s2321_s0 + $0x8] sm:$0xff] }
   0x8   :  { %1567 = vset.pattern.permute.xlu0 %v1642_v0  ;;  %76 = vperm.xlu2 %1569, %v43_v1   ;;  %v42_v5 = vld [vmem:[%s2321_s0 + $0x20] sm:$0xff]  ;;  %v47_v7 = vld [vmem:[%s2321_s0 + $0x50] sm:$0xff]  ;;  %v46_v8 = vld [vmem:[%s2321_s0 + $0x48] sm:$0xff] }
   0x9   :  { %70 = vperm.xlu1 %1568, %v41_v2   ;;  %64 = vperm.xlu0 %1567, %v39_v3   ;;  %v45_v9 = vld [vmem:[%s2321_s0 + $0x40] sm:$0xff]  ;;  %v50_v10 = vld [vmem:[%s2321_s0 + $0x70] sm:$0xff]  ;;  %v49_v11 = vld [vmem:[%s2321_s0 + $0x68] sm:$0xff] }
   0xa   :  { %v48_v12 = vld [vmem:[%s2321_s0 + $0x60] sm:$0xff]  ;;  %v53_v13 = vld [vmem:[%s2321_s0 + $0x90] sm:$0xff]  ;;  %v52_v14 = vld [vmem:[%s2321_s0 + $0x88] sm:$0xff] }
   0xb   :  { %v51_v15 = vld [vmem:[%s2321_s0 + $0x80] sm:$0xff]  ;;  %v56_v16 = vld [vmem:[%s2321_s0 + $0xb0] sm:$0xff]  ;;  %v55_v17 = vld [vmem:[%s2321_s0 + $0xa8] sm:$0xff] }
   0xc   :  { %v54_v18 = vld [vmem:[%s2321_s0 + $0xa0] sm:$0xff]  ;;  %v59_v19 = vld [vmem:[%s2321_s0 + $0xd0] sm:$0xff]  ;;  %v58_v20 = vld [vmem:[%s2321_s0 + $0xc8] sm:$0xff] }
   0xd   :  { %v57_v21 = vld [vmem:[%s2321_s0 + $0xc0] sm:$0xff]  ;;  %v222_v22 = vld [vmem:[#allocation2 + $0x78] sm:$0xff]  ;;  %v221_v23 = vld [vmem:[#allocation2 + $0x70] sm:$0xff] }
   0xe   :  { %497 = vmatpush.msra.mxu1 %v222_v22  ;;  %v62_v24 = vld [vmem:[%s2321_s0 + $0xf0] sm:$0xff]  ;;  %v61_v25 = vld [vmem:[%s2321_s0 + $0xe8] sm:$0xff]  ;;  %v60_v26 = vld [vmem:[%s2321_s0 + $0xe0] sm:$0xff] }
   0xf   :  { %v220_v27 = vld [vmem:[#allocation2 + $0x68] sm:$0xff]  ;;  %v219_v28 = vld [vmem:[#allocation2 + $0x60] sm:$0xff]  ;;  %v218_v29 = vld [vmem:[#allocation2 + $0x58] sm:$0xff] }
  0x10   :  { %79 = vperm.xlu2 %1569, %v44_v4   ;;  %498 = vmatpush.msra.mxu1 %v221_v23  ;;  %v225_v30 = vld [vmem:[%s2321_s0 + $0x11] sm:$0xff]  ;;  %v224_v31 = vld [vmem:[%s2321_s0 + $0x9] sm:$0xff]  ;;  %v223_v32 = vld [vmem:[%s2321_s0 + $0x1] sm:$0xff]  ;;  %v1819_v4 = vand.u32 127, %v37_v62 }
  0x11   :  { %73 = vperm.xlu1 %1568, %v42_v5   ;;  %67 = vperm.xlu0 %1567, %v40_v6   ;;  %v217_v33 = vld [vmem:[#allocation2 + $0x50] sm:$0xff]  ;;  %v216_v34 = vld [vmem:[#allocation2 + $0x48] sm:$0xff]  ;;  %v215_v35 = vld [vmem:[#allocation2 + $0x40] sm:$0xff] }
  0x12   :  { %499 = vmatpush.msra.mxu1 %v220_v27  ;;  %v214_v36 = vld [vmem:[#allocation2 + $0x38] sm:$0xff]  ;;  %v227_v38 = vld [vmem:[%s2321_s0 + $0x29] sm:$0xff]  ;;  %v226_v39 = vld [vmem:[%s2321_s0 + $0x21] sm:$0xff] }
  0x13   :  { %v228_v37 = vld [vmem:[%s2321_s0 + $0x31] sm:$0xff]  ;;  %v212_v41 = vld [vmem:[#allocation2 + $0x28] sm:$0xff]  ;;  %v211_v42 = vld [vmem:[#allocation2 + $0x20] sm:$0xff] }
  0x14   :  { %500 = vmatpush.msra.mxu1 %v219_v28  ;;  %v213_v40 = vld [vmem:[#allocation2 + $0x30] sm:$0xff]  ;;  %v210_v43 = vld [vmem:[#allocation2 + $0x18] sm:$0xff]  ;;  %v586_v44 = vld [vmem:[%s2321_s0 + $0x2] sm:$0xff] }
  0x15   :  { %v230_v45 = vld [vmem:[%s2321_s0 + $0x49] sm:$0xff]  ;;  %v229_v46 = vld [vmem:[%s2321_s0 + $0x41] sm:$0xff]  ;;  %v886_v55 = vld [vmem:[%s2321_s0 + $0x13] sm:$0xff] }
  0x16   :  { %501 = vmatpush.msra.mxu1 %v218_v29  ;;  %v209_v47 = vld [vmem:[#allocation2 + $0x10] sm:$0xff]  ;;  %v208_v48 = vld [vmem:[#allocation2 + $0x8] sm:$0xff]  ;;  %v207_v49 = vld [vmem:[#allocation2] sm:$0xff] }
  0x17   :  { %v885_v50 = vld [vmem:[%s2321_s0 + $0xb] sm:$0xff]  ;;  %v884_v52 = vld [vmem:[%s2321_s0 + $0x3] sm:$0xff]  ;;  %v889_v0 = vld [vmem:[%s2321_s0 + $0x33] sm:$0xff] }
  0x18   :  { %88 = vperm.xlu2 %1569, %v47_v7   ;;  %502 = vmatpush.msra.mxu1 %v217_v33  ;;  %v587_v51 = vld [vmem:[%s2321_s0 + $0xa] sm:$0xff]  ;;  %v589_v54 = vld [vmem:[%s2321_s0 + $0x22] sm:$0xff]  ;;  %v588_v56 = vld [vmem:[%s2321_s0 + $0x12] sm:$0xff] }
  0x19   :  { %85 = vperm.xlu1 %1568, %v46_v8   ;;  %82 = vperm.xlu0 %1567, %v45_v9   ;;  %v888_v58 = vld [vmem:[%s2321_s0 + $0x2b] sm:$0xff]  ;;  %v887_v60 = vld [vmem:[%s2321_s0 + $0x23] sm:$0xff]  ;;  %v770_v1 = vld [vmem:[#allocation2 + $0x178] sm:$0xff] }
  0x1a   :  { %503 = vmatpush.msra.mxu1 %v216_v34  ;;  %v590_v59 = vld [vmem:[%s2321_s0 + $0x2a] sm:$0xff]  ;;  %v592_v63 = vld [vmem:[%s2321_s0 + $0x42] sm:$0xff]  ;;  %v591_v2 = vld [vmem:[%s2321_s0 + $0x32] sm:$0xff]  ;;  %771 = vmatpush.msra.mxu2 %v770_v1 }
  0x1b   :  { %v769_v3 = vld [vmem:[#allocation2 + $0x170] sm:$0xff]  ;;  %v768_v5 = vld [vmem:[#allocation2 + $0x168] sm:$0xff]  ;;  %v767_v9 = vld [vmem:[#allocation2 + $0x160] sm:$0xff] }
  0x1c   :  { %504 = vmatpush.msra.mxu1 %v215_v35  ;;  %772 = vmatpush.msra.mxu2 %v769_v3  ;;  %v404_v23 = vld [vmem:[#allocation2 + $0xe0] sm:$0xff]  ;;  %v403_v27 = vld [vmem:[#allocation2 + $0xd8] sm:$0xff]  ;;  %v760_v35 = vld [vmem:[#allocation2 + $0x128] sm:$0xff] }
  0x1d   :  { %v594_v28 = vld [vmem:[%s2321_s0 + $0x52] sm:$0xff]  ;;  %v393_v3 = vld [vmem:[#allocation2 + $0x88] sm:$0xff] }
  0x1e   :  { %505 = vmatpush.msra.mxu1 %v214_v36  ;;  %773 = vmatpush.msra.mxu2 %v768_v5  ;;  %v762_v29 = vld [vmem:[#allocation2 + $0x138] sm:$0xff]  ;;  %v394_v62 = vld [vmem:[#allocation2 + $0x90] sm:$0xff]  ;;  %v1065_v5 = vld [vmem:[#allocation2 + $0x1e0] sm:$0xff] }
  0x20   :  { %97 = vperm.xlu2 %1569, %v50_v10   ;;  %506 = vmatpush.msra.mxu1 %v213_v40  ;;  %v891_v10 = vld [vmem:[%s2321_s0 + $0x4b] sm:$0xff]  ;;  %v893_v40 = vld [vmem:[%s2321_s0 + $0x63] sm:$0xff] }
  0x21   :  { %94 = vperm.xlu1 %1568, %v49_v11   ;;  %91 = vperm.xlu0 %1567, %v48_v12   ;;  %v1643_v11 = vmov 1.0   ;;  %v593_v12 = vld [vmem:[%s2321_s0 + $0x4a] sm:$0xff] }
  0x22   :  { %507 = vmatpush.msra.mxu1 %v212_v41  ;;  %774 = vmatpush.msra.mxu2 %v767_v9  ;;  %v595_v41 = vld [vmem:[%s2321_s0 + $0x62] sm:$0xff]  ;;  %v597_v9 = vld [vmem:[%s2321_s0 + $0x72] sm:$0xff] }
  0x24   :  { %508 = vmatpush.msra.mxu1 %v211_v42  ;;  %v399_v42 = vld [vmem:[#allocation2 + $0xb8] sm:$0xff] }
  0x26   :  { %509 = vmatpush.msra.mxu1 %v210_v43  ;;  %v758_v43 = vld [vmem:[#allocation2 + $0x118] sm:$0xff] }
  0x28   :  { %106 = vperm.xlu2 %1569, %v53_v13   ;;  %510 = vmatpush.msra.mxu1 %v209_v47  ;;  %v407_v13 = vld [vmem:[#allocation2 + $0xf8] sm:$0xff] }
  0x29   :  { %103 = vperm.xlu1 %1568, %v52_v14   ;;  %100 = vperm.xlu0 %1567, %v51_v15   ;;  %v766_v14 = vld [vmem:[#allocation2 + $0x158] sm:$0xff]  ;;  %v890_v15 = vld [vmem:[%s2321_s0 + $0x43] sm:$0xff] }
  0x2a   :  { %511 = vmatpush.msra.mxu1 %v208_v48  ;;  %408 = vmatpush.msra.mxu0 %v407_v13  ;;  %v397_v48 = vld [vmem:[#allocation2 + $0xa8] sm:$0xff] }
  0x2b   :  { %775 = vmatpush.msra.mxu2 %v766_v14 }
  0x2c   :  { %512 = vmatpush.msra.mxu1 %v207_v49 }
  0x30   :  { %115 = vperm.xlu2 %1569, %v56_v16   ;;  %v406_v16 = vld [vmem:[#allocation2 + $0xf0] sm:$0xff] }
  0x31   :  { %112 = vperm.xlu1 %1568, %v55_v17   ;;  %109 = vperm.xlu0 %1567, %v54_v18   ;;  %v765_v17 = vld [vmem:[#allocation2 + $0x150] sm:$0xff]  ;;  %v405_v18 = vld [vmem:[#allocation2 + $0xe8] sm:$0xff] }
  0x32   :  { %409 = vmatpush.msra.mxu0 %v406_v16  ;;  %776 = vmatpush.msra.mxu2 %v765_v17  ;;  %v1062_v16 = vld [vmem:[#allocation2 + $0x1c8] sm:$0xff] }
  0x33   :  { %v235_v17 = vld [vmem:[%s2321_s0 + $0x81] sm:$0xff] }
  0x34   :  { %410 = vmatpush.msra.mxu0 %v405_v18  ;;  %v896_v18 = vld [vmem:[%s2321_s0 + $0x83] sm:$0xff] }
  0x36   :  { %411 = vmatpush.msra.mxu0 %v404_v23 }
  0x38   :  { %124 = vperm.xlu2 %1569, %v59_v19   ;;  %v764_v19 = vld [vmem:[#allocation2 + $0x148] sm:$0xff]  ;;  %412 = vmatpush.msra.mxu0 %v403_v27 }
  0x39   :  { %121 = vperm.xlu1 %1568, %v58_v20   ;;  %118 = vperm.xlu0 %1567, %v57_v21   ;;  %v236_v27 = vld [vmem:[%s2321_s0 + $0x89] sm:$0xff] }
  0x3a   :  { %777 = vmatpush.msra.mxu2 %v764_v19  ;;  %v598_v19 = vld [vmem:[%s2321_s0 + $0x82] sm:$0xff] }
  0x40   :  { %133 = vperm.xlu2 %1569, %v62_v24   ;;  %v763_v24 = vld [vmem:[#allocation2 + $0x140] sm:$0xff] }
  0x41   :  { %130 = vperm.xlu1 %1568, %v61_v25   ;;  %127 = vperm.xlu0 %1567, %v60_v26   ;;  %v231_v25 = vld [vmem:[%s2321_s0 + $0x51] sm:$0xff] }
  0x42   :  { %v892_v26 = vld [vmem:[%s2321_s0 + $0x53] sm:$0xff]  ;;  %778 = vmatpush.msra.mxu2 %v763_v24 }
  0x43   :  { %v1059_v24 = vld [vmem:[#allocation2 + $0x1b0] sm:$0xff] }
  0x44   :  { %779 = vmatpush.msra.mxu2 %v762_v29  ;;  %v599_v29 = vld [vmem:[%s2321_s0 + $0x8a] sm:$0xff] }
  0x48   :  { %254 = vperm.xlu2 %1569, %v225_v30   ;;  %v402_v30 = vld [vmem:[#allocation2 + $0xd0] sm:$0xff] }
  0x49   :  { %251 = vperm.xlu1 %1568, %v224_v31   ;;  %248 = vperm.xlu0 %1567, %v223_v32   ;;  %v761_v31 = vld [vmem:[#allocation2 + $0x130] sm:$0xff]  ;;  %v401_v32 = vld [vmem:[#allocation2 + $0xc8] sm:$0xff] }
  0x4a   :  { %413 = vmatpush.msra.mxu0 %v402_v30  ;;  %780 = vmatpush.msra.mxu2 %v761_v31  ;;  %v1057_v30 = vld [vmem:[#allocation2 + $0x1a0] sm:$0xff]  ;;  %v1056_v31 = vld [vmem:[#allocation2 + $0x198] sm:$0xff] }
  0x4c   :  { %414 = vmatpush.msra.mxu0 %v401_v32  ;;  %781 = vmatpush.msra.mxu2 %v760_v35 }
  0x50   :  { %263 = vperm.xlu2 %1569, %v228_v37   ;;  %v400_v37 = vld [vmem:[#allocation2 + $0xc0] sm:$0xff] }
  0x51   :  { %260 = vperm.xlu1 %1568, %v227_v38   ;;  %257 = vperm.xlu0 %1567, %v226_v39   ;;  %v759_v38 = vld [vmem:[#allocation2 + $0x120] sm:$0xff] }
  0x52   :  { %v232_v39 = vld [vmem:[%s2321_s0 + $0x61] sm:$0xff]  ;;  %415 = vmatpush.msra.mxu0 %v400_v37  ;;  %782 = vmatpush.msra.mxu2 %v759_v38 }
  0x53   :  { %v1054_v38 = vld [vmem:[#allocation2 + $0x188] sm:$0xff] }
  0x54   :  { %416 = vmatpush.msra.mxu0 %v399_v42  ;;  %783 = vmatpush.msra.mxu2 %v758_v43  ;;  %v1053_v42 = vld [vmem:[#allocation2 + $0x180] sm:$0xff] }
  0x58   :  { %611 = vperm.xlu2 %1569, %v586_v44   ;;  %v398_v44 = vld [vmem:[#allocation2 + $0xb0] sm:$0xff] }
  0x59   :  { %269 = vperm.xlu1 %1568, %v230_v45   ;;  %266 = vperm.xlu0 %1567, %v229_v46   ;;  %v757_v45 = vld [vmem:[#allocation2 + $0x110] sm:$0xff] }
  0x5a   :  { %417 = vmatpush.msra.mxu0 %v398_v44  ;;  %784 = vmatpush.msra.mxu2 %v757_v45  ;;  %v238_v45 = vld [vmem:[%s2321_s0 + $0xa1] sm:$0xff] }
  0x5c   :  { %418 = vmatpush.msra.mxu0 %v397_v48  ;;  %v899_v48 = vld [vmem:[%s2321_s0 + $0xa3] sm:$0xff] }
  0x60   :  { %912 = vperm.xlu2 %1569, %v885_v50   ;;  %v756_v50 = vld [vmem:[#allocation2 + $0x108] sm:$0xff] }
  0x61   :  { %614 = vperm.xlu1 %1568, %v587_v51   ;;  %909 = vperm.xlu0 %1567, %v884_v52   ;;  %v396_v51 = vld [vmem:[#allocation2 + $0xa0] sm:$0xff]  ;;  %v233_v52 = vld [vmem:[%s2321_s0 + $0x69] sm:$0xff] }
  0x62   :  { %v1786_v53 = vpop.permute.xlu2 %76  ;;  %785 = vmatpush.msra.mxu2 %v756_v50  ;;  %419 = vmatpush.msra.mxu0 %v396_v51  ;;  %v601_v50 = vld [vmem:[%s2321_s0 + $0xa2] sm:$0xff] }
  0x63   :  { %vm139_vm4 = vcmp.eq.s32.totalorder %v1819_v4, %v1786_v53  ;;  %v1064_v53 = vld [vmem:[#allocation2 + $0x1d8] sm:$0xff] }
  0x68   :  { %620 = vperm.xlu2 %1569, %v589_v54   ;;  %v894_v54 = vld [vmem:[%s2321_s0 + $0x6b] sm:$0xff] }
  0x69   :  { %915 = vperm.xlu1 %1568, %v886_v55   ;;  %617 = vperm.xlu0 %1567, %v588_v56   ;;  %v1068_v55 = vld [vmem:[#allocation2 + $0x1f8] sm:$0xff]  ;;  %v596_v56 = vld [vmem:[%s2321_s0 + $0x6a] sm:$0xff] }
  0x6a   :  { %v1797_v57 = vpop.permute.xlu2 %79  ;;  %1069 = vmatpush.msra.mxu3 %v1068_v55  ;;  %v900_v55 = vld [vmem:[%s2321_s0 + $0xab] sm:$0xff] }
  0x6b   :  { %vm140_vm5 = vcmp.eq.s32.totalorder %v1819_v4, %v1797_v57  ;;  %v1060_v57 = vld [vmem:[#allocation2 + $0x1b8] sm:$0xff] }
  0x70   :  { %921 = vperm.xlu2 %1569, %v888_v58   ;;  %v755_v58 = vld [vmem:[#allocation2 + $0x100] sm:$0xff] }
  0x71   :  { %623 = vperm.xlu1 %1568, %v590_v59   ;;  %918 = vperm.xlu0 %1567, %v887_v60   ;;  %v395_v59 = vld [vmem:[#allocation2 + $0x98] sm:$0xff]  ;;  %v1067_v60 = vld [vmem:[#allocation2 + $0x1f0] sm:$0xff] }
  0x72   :  { %v1808_v61 = vpop.permute.xlu2 %88  ;;  %786 = vmatpush.msra.mxu2 %v755_v58  ;;  %420 = vmatpush.msra.mxu0 %v395_v59 }
  0x73   :  { %1070 = vmatpush.msra.mxu3 %v1067_v60  ;;  %vm143_vm9 = vcmp.eq.s32.totalorder %v1819_v4, %v1808_v61  ;;  %v240_v60 = vld [vmem:[%s2321_s0 + $0xb1] sm:$0xff] }
  0x74   :  { %421 = vmatpush.msra.mxu0 %v394_v62  ;;  %v901_v62 = vld [vmem:[%s2321_s0 + $0xb3] sm:$0xff] }
  0x76   :  { %422 = vmatpush.msra.mxu0 %v393_v3 }
  0x78   :  { %629 = vperm.xlu2 %1569, %v592_v63   ;;  %v1066_v63 = vld [vmem:[#allocation2 + $0x1e8] sm:$0xff] }
  0x79   :  { %924 = vperm.xlu1 %1568, %v889_v0   ;;  %626 = vperm.xlu0 %1567, %v591_v2  }
  0x7a   :  { %v1821_v6 = vpop.permute.xlu2 %97  ;;  %1071 = vmatpush.msra.mxu3 %v1066_v63  ;;  %v603_v63 = vld [vmem:[%s2321_s0 + $0xb2] sm:$0xff] }
  0x7b   :  { %v71_v7 = vpop.permute.xlu1 %70  ;;  %v65_v8 = vpop.permute.xlu0 %64 }
  0x7c   :  { %vm135_vm0 = vcmp.eq.s32.totalorder %v1819_v4, %v65_v8  ;;  %vm137_vm2 = vcmp.eq.s32.totalorder %v1819_v4, %v71_v7  ;;  %v234_v7 = vld [vmem:[%s2321_s0 + $0x71] sm:$0xff]  ;;  %1072 = vmatpush.msra.mxu3 %v1065_v5 }
  0x7d   :  { %1441 = vmatmul.msk.f32.vlgmr.msra.gmra.mxu1 %vm135_vm0, %v1643_v11  ;;  %v895_v8 = vld [vmem:[%s2321_s0 + $0x73] sm:$0xff]  ;;  %vm146_vm0 = vcmp.eq.s32.totalorder %v1819_v4, %v1821_v6  ;;  %v604_v6 = vld [vmem:[%s2321_s0 + $0xc2] sm:$0xff] }
  0x7e   :  { %1073 = vmatpush.msra.mxu3 %v1064_v53 }
  0x80   :  { %930 = vperm.xlu2 %1569, %v891_v10   ;;  %v392_v10 = vld [vmem:[#allocation2 + $0x80] sm:$0xff] }
  0x81   :  { %632 = vperm.xlu1 %1568, %v593_v12   ;;  %927 = vperm.xlu0 %1567, %v890_v15   ;;  %v1063_v12 = vld [vmem:[#allocation2 + $0x1d0] sm:$0xff] }
  0x82   :  { %v1834_v20 = vpop.permute.xlu2 %106  ;;  %423 = vmatpush.msra.mxu0 %v392_v10  ;;  %1074 = vmatpush.msra.mxu3 %v1063_v12  ;;  %v242_v12 = vld [vmem:[%s2321_s0 + $0xc9] sm:$0xff] }
  0x83   :  { %v74_v21 = vpop.permute.xlu1 %73  ;;  %v68_v22 = vpop.permute.xlu0 %67 }
  0x84   :  { %vm136_vm1 = vcmp.eq.s32.totalorder %v1819_v4, %v68_v22  ;;  %vm138_vm3 = vcmp.eq.s32.totalorder %v1819_v4, %v74_v21  ;;  %1075 = vmatpush.msra.mxu3 %v1062_v16  ;;  %v1061_v21 = vld [vmem:[#allocation2 + $0x1c0] sm:$0xff] }
  0x85   :  { %1442 = vmatmul.msk.f32.gmra.mxu1 %vm136_vm1, %v1643_v11 }
  0x86   :  { %1076 = vmatpush.msra.mxu3 %v1061_v21  ;;  %v606_v21 = vld [vmem:[%s2321_s0 + $0xd2] sm:$0xff] }
  0x88   :  { %272 = vperm.xlu2 %1569, %v231_v25   ;;  %1077 = vmatpush.msra.mxu3 %v1060_v57 }
  0x89   :  { %933 = vperm.xlu1 %1568, %v892_v26   ;;  %635 = vperm.xlu0 %1567, %v594_v28   ;;  %v1058_v26 = vld [vmem:[#allocation2 + $0x1a8] sm:$0xff] }
  0x8a   :  { %v1847_v33 = vpop.permute.xlu2 %115  ;;  %v897_v28 = vld [vmem:[%s2321_s0 + $0x8b] sm:$0xff]  ;;  %1078 = vmatpush.msra.mxu3 %v1059_v24 }
  0x8b   :  { %v1849_v34 = vpop.permute.xlu1 %85  ;;  %v1851_v36 = vpop.permute.xlu0 %82 }
  0x8c   :  { %vm141_vm6 = vcmp.eq.s32.totalorder %v1819_v4, %v1851_v36  ;;  %1079 = vmatpush.msra.mxu3 %v1058_v26  ;;  %v1055_v36 = vld [vmem:[#allocation2 + $0x190] sm:$0xff]  ;;  %vm142_vm8 = vcmp.eq.s32.totalorder %v1819_v4, %v1849_v34  ;;  %v244_v26 = vld [vmem:[%s2321_s0 + $0xe1] sm:$0xff] }
  0x8d   :  { %1443 = vmatmul.msk.f32.gmra.mxu1 %vm137_vm2, %v1643_v11 }
  0x8e   :  { %1080 = vmatpush.msra.mxu3 %v1057_v30 }
  0x90   :  { %275 = vperm.xlu2 %1569, %v232_v39   ;;  %1081 = vmatpush.msra.mxu3 %v1056_v31  ;;  %v237_v39 = vld [vmem:[%s2321_s0 + $0x91] sm:$0xff]  ;;  %v245_v31 = vld [vmem:[%s2321_s0 + $0xe9] sm:$0xff] }
  0x91   :  { %936 = vperm.xlu1 %1568, %v893_v40   ;;  %638 = vperm.xlu0 %1567, %v595_v41   ;;  %v898_v40 = vld [vmem:[%s2321_s0 + $0x93] sm:$0xff] }
  0x92   :  { %v1864_v46 = vpop.permute.xlu2 %124  ;;  %1082 = vmatpush.msra.mxu3 %v1055_v36  ;;  %v600_v41 = vld [vmem:[%s2321_s0 + $0x92] sm:$0xff] }
  0x93   :  { %v1866_v47 = vpop.permute.xlu1 %94  ;;  %v1868_v49 = vpop.permute.xlu0 %91 }
  0x94   :  { %1083 = vmatpush.msra.mxu3 %v1054_v38  ;;  %vm144_vm11 = vcmp.eq.s32.totalorder %v1819_v4, %v1868_v49  ;;  %vm145_vm13 = vcmp.eq.s32.totalorder %v1819_v4, %v1866_v47 }
  0x95   :  { %1444 = vmatmul.msk.f32.gmra.mxu1 %vm138_vm3, %v1643_v11 }
  0x96   :  { %1084 = vmatpush.msra.mxu3 %v1053_v42 }
  0x98   :  { %278 = vperm.xlu2 %1569, %v233_v52  }
  0x99   :  { %939 = vperm.xlu1 %1568, %v894_v54   ;;  %641 = vperm.xlu0 %1567, %v596_v56   ;;  %v239_v54 = vld [vmem:[%s2321_s0 + $0xa9] sm:$0xff] }
  0x9a   :  { %v1881_v0 = vpop.permute.xlu2 %133  ;;  %v602_v56 = vld [vmem:[%s2321_s0 + $0xaa] sm:$0xff] }
  0x9b   :  { %v1883_v1 = vpop.permute.xlu1 %103  ;;  %v1885_v2 = vpop.permute.xlu0 %100 }
  0x9c   :  { %vm147_vm3 = vcmp.eq.s32.totalorder %v1819_v4, %v1885_v2  ;;  %v605_v2 = vld [vmem:[%s2321_s0 + $0xca] sm:$0xff] }
  0x9d   :  { %1445 = vmatmul.msk.f32.gmra.mxu1 %vm139_vm4, %v1643_v11 }
  0xa0   :  { %281 = vperm.xlu2 %1569, %v234_v7   ;;  %v241_v7 = vld [vmem:[%s2321_s0 + $0xc1] sm:$0xff] }
  0xa1   :  { %942 = vperm.xlu1 %1568, %v895_v8   ;;  %644 = vperm.xlu0 %1567, %v597_v9   ;;  %v902_v8 = vld [vmem:[%s2321_s0 + $0xc3] sm:$0xff] }
  0xa2   :  { %v1899_v13 = vpop.permute.xlu2 %254 }
  0xa3   :  { %v1901_v14 = vpop.permute.xlu1 %112  ;;  %v1903_v15 = vpop.permute.xlu0 %109  ;;  %vm321_vm14 = vcmp.eq.s32.totalorder %v1819_v4, %v1899_v13  ;;  %v903_v13 = vld [vmem:[%s2321_s0 + $0xcb] sm:$0xff] }
  0xa5   :  { %1446 = vmatmul.msk.f32.gmra.mxu1 %vm140_vm5, %v1643_v11 }
  0xa8   :  { %284 = vperm.xlu2 %1569, %v235_v17  }
  0xa9   :  { %945 = vperm.xlu1 %1568, %v896_v18   ;;  %647 = vperm.xlu0 %1567, %v598_v19   ;;  %v243_v19 = vld [vmem:[%s2321_s0 + $0xd1] sm:$0xff] }
  0xaa   :  { %v1917_v22 = vpop.permute.xlu2 %263 }
  0xab   :  { %v1919_v23 = vpop.permute.xlu1 %121  ;;  %v1921_v25 = vpop.permute.xlu0 %118 }
  0xad   :  { %1447 = vmatmul.msk.f32.gmra.mxu1 %vm141_vm6, %v1643_v11 }
  0xb0   :  { %287 = vperm.xlu2 %1569, %v236_v27   ;;  %v905_v27 = vld [vmem:[%s2321_s0 + $0xe3] sm:$0xff] }
  0xb1   :  { %948 = vperm.xlu1 %1568, %v897_v28   ;;  %650 = vperm.xlu0 %1567, %v599_v29  }
  0xb2   :  { %v612_v32 = vpop.permute.xlu2 %611 }
  0xb3   :  { %v1935_v35 = vpop.permute.xlu1 %130  ;;  %vm682_vm7 = vcmp.eq.s32.totalorder %v1819_v4, %v612_v32  ;;  %v1938_v37 = vpop.permute.xlu0 %127  ;;  %v608_v32 = vld [vmem:[%s2321_s0 + $0xea] sm:$0xff] }
  0xb4   :  { %1489 = vmatmul.msk.f32.vlgmr.msra.gmra.mxu2 %vm682_vm7, %v1643_v11  ;;  %vm148_vm7 = vcmp.eq.s32.totalorder %v1819_v4, %v1883_v1  ;;  %v904_v1 = vld [vmem:[%s2321_s0 + $0xd3] sm:$0xff] }
  0xb5   :  { %1448 = vmatmul.msk.f32.gmra.mxu1 %vm142_vm8, %v1643_v11  ;;  %vm324_vm8 = vcmp.eq.s32.totalorder %v1819_v4, %v1917_v22 }
  0xb8   :  { %290 = vperm.xlu2 %1569, %v237_v39  }
  0xb9   :  { %951 = vperm.xlu1 %1568, %v898_v40   ;;  %653 = vperm.xlu0 %1567, %v600_v41   ;;  %v246_v40 = vld [vmem:[%s2321_s0 + $0xf1] sm:$0xff] }
  0xba   :  { %v1953_v34 = vpop.permute.xlu2 %912  ;;  %v907_v41 = vld [vmem:[%s2321_s0 + $0xf3] sm:$0xff] }
  0xbb   :  { %v252_v43 = vpop.permute.xlu1 %251  ;;  %v249_v44 = vpop.permute.xlu0 %248  ;;  %vm981_vm6 = vcmp.eq.s32.totalorder %v1819_v4, %v1953_v34 }
  0xbc   :  { %vm319_vm10 = vcmp.eq.s32.totalorder %v1819_v4, %v249_v44  ;;  %vm320_vm12 = vcmp.eq.s32.totalorder %v1819_v4, %v252_v43  ;;  %v1293_v44 = vld [vmem:[%s2322_s1] sm:$0xff] }
  0xbd   :  { %1417 = vmatmul.msk.f32.vlgmr.msra.gmra.mxu0 %vm319_vm10, %v1643_v11  ;;  %1449 = vmatmul.msk.f32.gmra.mxu1 %vm143_vm9, %v1643_v11 }
  0xc0   :  { %293 = vperm.xlu2 %1569, %v238_v45  }
  0xc1   :  { %954 = vperm.xlu1 %1568, %v899_v48   ;;  %656 = vperm.xlu0 %1567, %v601_v50  }
  0xc2   :  { %v1969_v61 = vpop.permute.xlu2 %620 }
  0xc3   :  { %v261_v51 = vpop.permute.xlu1 %260  ;;  %v258_v52 = vpop.permute.xlu0 %257  ;;  %vm685_vm9 = vcmp.eq.s32.totalorder %v1819_v4, %v1969_v61 }
  0xc4   :  { %vm322_vm1 = vcmp.eq.s32.totalorder %v1819_v4, %v258_v52  ;;  %vm323_vm4 = vcmp.eq.s32.totalorder %v1819_v4, %v261_v51 }
  0xc5   :  { %1418 = vmatmul.msk.f32.gmra.mxu0 %vm320_vm12, %v1643_v11  ;;  %1450 = vmatmul.msk.f32.gmra.mxu1 %vm144_vm11, %v1643_v11  ;;  %vm149_vm11 = vcmp.eq.s32.totalorder %v1819_v4, %v1834_v20  ;;  %v607_v20 = vld [vmem:[%s2321_s0 + $0xe2] sm:$0xff] }
  0xc8   :  { %296 = vperm.xlu2 %1569, %v239_v54  }
  0xc9   :  { %957 = vperm.xlu1 %1568, %v900_v55   ;;  %659 = vperm.xlu0 %1567, %v602_v56  }
  0xca   :  { %v1985_v49 = vpop.permute.xlu2 %921 }
  0xcb   :  { %v1987_v58 = vpop.permute.xlu1 %269  ;;  %v1989_v59 = vpop.permute.xlu0 %266 }
  0xcc   :  { %vm325_vm12 = vcmp.eq.s32.totalorder %v1819_v4, %v1989_v59 }
  0xcd   :  { %1419 = vmatmul.msk.f32.gmra.mxu0 %vm321_vm14, %v1643_v11  ;;  %1451 = vmatmul.msk.f32.gmra.mxu1 %vm145_vm13, %v1643_v11 }
  0xd0   :  { %299 = vperm.xlu2 %1569, %v240_v60  }
  0xd1   :  { %960 = vperm.xlu1 %1568, %v901_v62   ;;  %662 = vperm.xlu0 %1567, %v603_v63  }
  0xd2   :  { %v2006_v47 = vpop.permute.xlu2 %629 }
  0xd3   :  { %v615_v3 = vpop.permute.xlu1 %614  ;;  %v910_v5 = vpop.permute.xlu0 %909 }
  0xd4   :  { %vm683_vm15 = vcmp.eq.s32.totalorder %v1819_v4, %v615_v3  ;;  %vm980_vm2 = vcmp.eq.s32.totalorder %v1819_v4, %v910_v5 }
  0xd5   :  { %1490 = vmatmul.msk.f32.gmra.mxu2 %vm683_vm15, %v1643_v11  ;;  %1420 = vmatmul.msk.f32.gmra.mxu0 %vm322_vm1, %v1643_v11  ;;  %vm150_vm15 = vcmp.eq.s32.totalorder %v1819_v4, %v1903_v15  ;;  %vm984_vm1 = vcmp.eq.s32.totalorder %v1819_v4, %v1985_v49  ;;  %v906_v15 = vld [vmem:[%s2321_s0 + $0xeb] sm:$0xff] }
  0xd6   :  { %1452 = vmatmul.msk.f32.gmra.mxu1 %vm146_vm0, %v1643_v11  ;;  %1537 = vmatmul.msk.f32.vlgmr.msra.gmra.mxu3 %vm980_vm2, %v1643_v11  ;;  %vm326_vm0 = vcmp.eq.s32.totalorder %v1819_v4, %v1987_v58 }
  0xd8   :  { %302 = vperm.xlu2 %1569, %v241_v7  }
  0xd9   :  { %963 = vperm.xlu1 %1568, %v902_v8   ;;  %665 = vperm.xlu0 %1567, %v604_v6  }
  0xda   :  { %v2026_v9 = vpop.permute.xlu2 %930 }
  0xdb   :  { %v916_v10 = vpop.permute.xlu1 %915  ;;  %v618_v53 = vpop.permute.xlu0 %617 }
  0xdc   :  { %vm684_vm5 = vcmp.eq.s32.totalorder %v1819_v4, %v618_v53  ;;  %vm982_vm10 = vcmp.eq.s32.totalorder %v1819_v4, %v916_v10 }
  0xdd   :  { %1421 = vmatmul.msk.f32.gmra.mxu0 %vm323_vm4, %v1643_v11  ;;  %1491 = vmatmul.msk.f32.gmra.mxu2 %vm684_vm5, %v1643_v11  ;;  %vm688_vm5 = vcmp.eq.s32.totalorder %v1819_v4, %v2006_v47 }
  0xde   :  { %1453 = vmatmul.msk.f32.gmra.mxu1 %vm147_vm3, %v1643_v11  ;;  %1538 = vmatmul.msk.f32.gmra.mxu3 %vm981_vm6, %v1643_v11  ;;  %vm151_vm3 = vcmp.eq.s32.totalorder %v1819_v4, %v1901_v14  ;;  %v609_v14 = vld [vmem:[%s2321_s0 + $0xf2] sm:$0xff] }
  0xe0   :  { %305 = vperm.xlu2 %1569, %v242_v12  }
  0xe1   :  { %966 = vperm.xlu1 %1568, %v903_v13   ;;  %668 = vperm.xlu0 %1567, %v605_v2  }
  0xe2   :  { %v273_v16 = vpop.permute.xlu2 %272 }
  0xe3   :  { %v624_v17 = vpop.permute.xlu1 %623  ;;  %v919_v18 = vpop.permute.xlu0 %918  ;;  %vm327_vm4 = vcmp.eq.s32.totalorder %v1819_v4, %v273_v16 }
  0xe4   :  { %vm686_vm13 = vcmp.eq.s32.totalorder %v1819_v4, %v624_v17  ;;  %vm983_vm14 = vcmp.eq.s32.totalorder %v1819_v4, %v919_v18 }
  0xe5   :  { %1422 = vmatmul.msk.f32.gmra.mxu0 %vm324_vm8, %v1643_v11  ;;  %1492 = vmatmul.msk.f32.gmra.mxu2 %vm685_vm9, %v1643_v11 }
  0xe6   :  { %1454 = vmatmul.msk.f32.gmra.mxu1 %vm148_vm7, %v1643_v11  ;;  %1539 = vmatmul.msk.f32.gmra.mxu3 %vm982_vm10, %v1643_v11  ;;  %vm152_vm7 = vcmp.eq.s32.totalorder %v1819_v4, %v1847_v33 }
  0xe8   :  { %308 = vperm.xlu2 %1569, %v243_v19  }
  0xe9   :  { %969 = vperm.xlu1 %1568, %v904_v1   ;;  %671 = vperm.xlu0 %1567, %v606_v21  }
  0xea   :  { %v276_v57 = vpop.permute.xlu2 %275 }
  0xeb   :  { %v925_v22 = vpop.permute.xlu1 %924  ;;  %v627_v24 = vpop.permute.xlu0 %626  ;;  %vm328_vm8 = vcmp.eq.s32.totalorder %v1819_v4, %v276_v57 }
  0xec   :  { %vm687_vm2 = vcmp.eq.s32.totalorder %v1819_v4, %v627_v24  ;;  %vm985_vm6 = vcmp.eq.s32.totalorder %v1819_v4, %v925_v22 }
  0xed   :  { %1423 = vmatmul.msk.f32.gmra.mxu0 %vm325_vm12, %v1643_v11  ;;  %1493 = vmatmul.msk.f32.gmra.mxu2 %vm686_vm13, %v1643_v11  ;;  %vm987_vm13 = vcmp.eq.s32.totalorder %v1819_v4, %v2026_v9 }
  0xee   :  { %1455 = vmatmul.msk.f32.gmra.mxu1 %vm149_vm11, %v1643_v11  ;;  %1540 = vmatmul.msk.f32.gmra.mxu3 %vm983_vm14, %v1643_v11  ;;  %vm153_vm11 = vcmp.eq.s32.totalorder %v1819_v4, %v1921_v25 }
  0xf0   :  { %311 = vperm.xlu2 %1569, %v244_v26  }
  0xf1   :  { %972 = vperm.xlu1 %1568, %v905_v27   ;;  %674 = vperm.xlu0 %1567, %v607_v20  }
  0xf2   :  { %v279_v28 = vpop.permute.xlu2 %278 }
  0xf3   :  { %v633_v29 = vpop.permute.xlu1 %632  ;;  %v928_v30 = vpop.permute.xlu0 %927  ;;  %vm329_vm12 = vcmp.eq.s32.totalorder %v1819_v4, %v279_v28 }
  0xf4   :  { %vm689_vm9 = vcmp.eq.s32.totalorder %v1819_v4, %v633_v29  ;;  %vm986_vm10 = vcmp.eq.s32.totalorder %v1819_v4, %v928_v30 }
  0xf5   :  { %1424 = vmatmul.msk.f32.gmra.mxu0 %vm326_vm0, %v1643_v11  ;;  %1494 = vmatmul.msk.f32.gmra.mxu2 %vm687_vm2, %v1643_v11 }
  0xf6   :  { %1456 = vmatmul.msk.f32.gmra.mxu1 %vm150_vm15, %v1643_v11  ;;  %1541 = vmatmul.msk.f32.gmra.mxu3 %vm984_vm1, %v1643_v11  ;;  %vm154_vm15 = vcmp.eq.s32.totalorder %v1819_v4, %v1919_v23 }
  0xf8   :  { %314 = vperm.xlu2 %1569, %v245_v31  }
  0xf9   :  { %975 = vperm.xlu1 %1568, %v906_v15   ;;  %677 = vperm.xlu0 %1567, %v608_v32  }
  0xfa   :  { %v282_v36 = vpop.permute.xlu2 %281  ;;  %v514_v51 = vpop.f32.mrf.mxu1 }
  0xfb   :  { %v934_v38 = vpop.permute.xlu1 %933  ;;  %v636_v39 = vpop.permute.xlu0 %635  ;;  %vm330_vm0 = vcmp.eq.s32.totalorder %v1819_v4, %v282_v36  ;;  %v2225_v36 = vld [vmem:[%s2325_s4] sm:$0xff] }
  0xfc   :  { %vm690_vm14 = vcmp.eq.s32.totalorder %v1819_v4, %v636_v39  ;;  %vm988_vm1 = vcmp.eq.s32.totalorder %v1819_v4, %v934_v38 }
  0xfd   :  { %1425 = vmatmul.msk.f32.gmra.mxu0 %vm327_vm4, %v1643_v11  ;;  %1495 = vmatmul.msk.f32.gmra.mxu2 %vm688_vm5, %v1643_v11 }
  0xfe   :  { %1457 = vmatmul.msk.f32.gmra.mxu1 %vm151_vm3, %v1643_v11  ;;  %1542 = vmatmul.msk.f32.gmra.mxu3 %vm985_vm6, %v1643_v11  ;;  %vm155_vm3 = vcmp.eq.s32.totalorder %v1819_v4, %v1864_v46 }
 0x100   :  { %317 = vperm.xlu2 %1569, %v246_v40   ;;  %v2230_v40 = vld [vmem:[%s2325_s4 + $0x8] sm:$0xff] }
 0x101   :  { %978 = vperm.xlu1 %1568, %v907_v41   ;;  %680 = vperm.xlu0 %1567, %v609_v14  }
 0x102   :  { %v285_v42 = vpop.permute.xlu2 %284  ;;  %v517_v46 = vpop.f32.mrf.mxu1 }
 0x103   :  { %v937_v34 = vpop.permute.xlu1 %936  ;;  %v639_v43 = vpop.permute.xlu0 %638  ;;  %vm331_vm4 = vcmp.eq.s32.totalorder %v1819_v4, %v285_v42 }
 0x104   :  { %vm691_vm2 = vcmp.eq.s32.totalorder %v1819_v4, %v639_v43  ;;  %vm989_vm5 = vcmp.eq.s32.totalorder %v1819_v4, %v937_v34 }
 0x105   :  { %1426 = vmatmul.msk.f32.gmra.mxu0 %vm328_vm8, %v1643_v11  ;;  %1496 = vmatmul.msk.f32.gmra.mxu2 %vm689_vm9, %v1643_v11 }
 0x106   :  { %1458 = vmatmul.msk.f32.gmra.mxu1 %vm152_vm7, %v1643_v11  ;;  %1543 = vmatmul.msk.f32.gmra.mxu3 %vm986_vm10, %v1643_v11  ;;  %vm156_vm7 = vcmp.eq.s32.totalorder %v1819_v4, %v1938_v37 }
 0x109   :  { %1296 = vperm.xlu0 %1567, %v1293_v44  }
 0x10a   :  { %v288_v48 = vpop.permute.xlu2 %287  ;;  %v520_v37 = vpop.f32.mrf.mxu1 }
 0x10b   :  { %v940_v33 = vpop.permute.xlu1 %939  ;;  %v642_v45 = vpop.permute.xlu0 %641  ;;  %vm332_vm8 = vcmp.eq.s32.totalorder %v1819_v4, %v288_v48 }
 0x10c   :  { %vm692_vm6 = vcmp.eq.s32.totalorder %v1819_v4, %v642_v45  ;;  %vm990_vm9 = vcmp.eq.s32.totalorder %v1819_v4, %v940_v33 }
 0x10d   :  { %1427 = vmatmul.msk.f32.gmra.mxu0 %vm329_vm12, %v1643_v11  ;;  %1497 = vmatmul.msk.f32.gmra.mxu2 %vm690_vm14, %v1643_v11 }
 0x10e   :  { %1459 = vmatmul.msk.f32.gmra.mxu1 %vm153_vm11, %v1643_v11  ;;  %1544 = vmatmul.msk.f32.gmra.mxu3 %vm987_vm13, %v1643_v11  ;;  %vm157_vm11 = vcmp.eq.s32.totalorder %v1819_v4, %v1935_v35 }
 0x112   :  { %v291_v25 = vpop.permute.xlu2 %290  ;;  %v523_v62 = vpop.f32.mrf.mxu1 }
 0x113   :  { %v943_v50 = vpop.permute.xlu1 %942  ;;  %v645_v61 = vpop.permute.xlu0 %644  ;;  %vm333_vm12 = vcmp.eq.s32.totalorder %v1819_v4, %v291_v25 }
 0x114   :  { %vm693_vm10 = vcmp.eq.s32.totalorder %v1819_v4, %v645_v61  ;;  %vm991_vm13 = vcmp.eq.s32.totalorder %v1819_v4, %v943_v50 }
 0x115   :  { %1428 = vmatmul.msk.f32.gmra.mxu0 %vm330_vm0, %v1643_v11  ;;  %1498 = vmatmul.msk.f32.gmra.mxu2 %vm691_vm2, %v1643_v11 }
 0x116   :  { %1460 = vmatmul.msk.f32.gmra.mxu1 %vm154_vm15, %v1643_v11  ;;  %1545 = vmatmul.msk.f32.gmra.mxu3 %vm988_vm1, %v1643_v11  ;;  %vm158_vm15 = vcmp.eq.s32.totalorder %v1819_v4, %v1881_v0 }
 0x11a   :  { %v294_v54 = vpop.permute.xlu2 %293  ;;  %v526_v6 = vpop.f32.mrf.mxu1 }
 0x11b   :  { %v648_v52 = vpop.permute.xlu0 %647  ;;  %v946_v23 = vpop.permute.xlu1 %945  ;;  %vm334_vm0 = vcmp.eq.s32.totalorder %v1819_v4, %v294_v54 }
 0x11c   :  { %vm694_vm14 = vcmp.eq.s32.totalorder %v1819_v4, %v648_v52  ;;  %vm992_vm1 = vcmp.eq.s32.totalorder %v1819_v4, %v946_v23 }
 0x11d   :  { %1429 = vmatmul.msk.f32.gmra.mxu0 %vm331_vm4, %v1643_v11  ;;  %1499 = vmatmul.msk.f32.gmra.mxu2 %vm692_vm6, %v1643_v11 }
 0x11e   :  { %1461 = vmatmul.msk.f32.gmra.mxu1 %vm155_vm3, %v1643_v11  ;;  %1546 = vmatmul.msk.f32.gmra.mxu3 %vm989_vm5, %v1643_v11 }
 0x122   :  { %v297_v49 = vpop.permute.xlu2 %296  ;;  %v529_v17 = vpop.f32.mrf.mxu1 }
 0x123   :  { %v651_v55 = vpop.permute.xlu0 %650  ;;  %v949_v56 = vpop.permute.xlu1 %948  ;;  %vm335_vm3 = vcmp.eq.s32.totalorder %v1819_v4, %v297_v49 }
 0x124   :  { %vm695_vm2 = vcmp.eq.s32.totalorder %v1819_v4, %v651_v55  ;;  %vm993_vm4 = vcmp.eq.s32.totalorder %v1819_v4, %v949_v56 }
 0x125   :  { %1430 = vmatmul.msk.f32.gmra.mxu0 %vm332_vm8, %v1643_v11  ;;  %1500 = vmatmul.msk.f32.gmra.mxu2 %vm693_vm10, %v1643_v11 }
 0x126   :  { %1462 = vmatmul.msk.f32.gmra.mxu1 %vm156_vm7, %v1643_v11  ;;  %1547 = vmatmul.msk.f32.gmra.mxu3 %vm990_vm9, %v1643_v11 }
 0x12a   :  { %v300_v35 = vpop.permute.xlu2 %299  ;;  %v532_v22 = vpop.f32.mrf.mxu1 }
 0x12b   :  { %v654_v58 = vpop.permute.xlu0 %653  ;;  %v952_v59 = vpop.permute.xlu1 %951  ;;  %vm336_vm6 = vcmp.eq.s32.totalorder %v1819_v4, %v300_v35 }
 0x12c   :  { %vm696_vm5 = vcmp.eq.s32.totalorder %v1819_v4, %v654_v58  ;;  %vm994_vm7 = vcmp.eq.s32.totalorder %v1819_v4, %v952_v59 }
 0x12d   :  { %1431 = vmatmul.msk.f32.gmra.mxu0 %vm333_vm12, %v1643_v11  ;;  %1501 = vmatmul.msk.f32.gmra.mxu2 %vm694_vm14, %v1643_v11 }
 0x12e   :  { %1463 = vmatmul.msk.f32.gmra.mxu1 %vm157_vm11, %v1643_v11  ;;  %1548 = vmatmul.msk.f32.gmra.mxu3 %vm991_vm13, %v1643_v11 }
 0x132   :  { %v303_v8 = vpop.permute.xlu2 %302  ;;  %v535_v32 = vpop.f32.mrf.mxu1 }
 0x133   :  { %v657_v60 = vpop.permute.xlu0 %656  ;;  %v955_v63 = vpop.permute.xlu1 %954  ;;  %vm337_vm9 = vcmp.eq.s32.totalorder %v1819_v4, %v303_v8 }
 0x134   :  { %vm697_vm8 = vcmp.eq.s32.totalorder %v1819_v4, %v657_v60  ;;  %vm995_vm10 = vcmp.eq.s32.totalorder %v1819_v4, %v955_v63 }
 0x135   :  { %1432 = vmatmul.msk.f32.gmra.mxu0 %vm334_vm0, %v1643_v11  ;;  %1502 = vmatmul.msk.f32.gmra.mxu2 %vm695_vm2, %v1643_v11 }
 0x136   :  { %1464 = vmatmul.msk.f32.gmra.mxu1 %vm158_vm15, %v1643_v11  ;;  %1549 = vmatmul.msk.f32.gmra.mxu3 %vm992_vm1, %v1643_v11 }
 0x137   :  { %v788_v0 = vpop.f32.mrf.mxu2 }
 0x13a   :  { %v425_v47 = vpop.f32.mrf.mxu0  ;;  %v306_v13 = vpop.permute.xlu2 %305 }
 0x13b   :  { %v515_v3 = vadd.f32 %v514_v51, %v425_v47  ;;  %v660_v5 = vpop.permute.xlu0 %659  ;;  %v958_v53 = vpop.permute.xlu1 %957  ;;  %vm338_vm12 = vcmp.eq.s32.totalorder %v1819_v4, %v306_v13  ;;  %v2243_v51 = vld [vmem:[%s2325_s4 + $0x10] sm:$0xff] }
 0x13c   :  { %vm698_vm11 = vcmp.eq.s32.totalorder %v1819_v4, %v660_v5  ;;  %vm996_vm13 = vcmp.eq.s32.totalorder %v1819_v4, %v958_v53 }
 0x13d   :  { %1433 = vmatmul.msk.f32.gmra.mxu0 %vm335_vm3, %v1643_v11  ;;  %v860_v7 = vadd.f32 %v788_v0, %v515_v3  ;;  %1503 = vmatmul.msk.f32.gmra.mxu2 %vm696_vm5, %v1643_v11 }
 0x13e   :  { %1550 = vmatmul.msk.f32.gmra.mxu3 %vm993_vm4, %v1643_v11 }
 0x142   :  { %v428_v9 = vpop.f32.mrf.mxu0  ;;  %v309_v1 = vpop.permute.xlu2 %308 }
 0x143   :  { %v518_v10 = vadd.f32 %v517_v46, %v428_v9  ;;  %v663_v12 = vpop.permute.xlu0 %662  ;;  %v961_v18 = vpop.permute.xlu1 %960  ;;  %vm339_vm15 = vcmp.eq.s32.totalorder %v1819_v4, %v309_v1 }
 0x144   :  { %vm699_vm14 = vcmp.eq.s32.totalorder %v1819_v4, %v663_v12  ;;  %vm997_vm0 = vcmp.eq.s32.totalorder %v1819_v4, %v961_v18  ;;  %v538_v46 = vpop.f32.mrf.mxu1 }
 0x145   :  { %1434 = vmatmul.msk.f32.gmra.mxu0 %vm336_vm6, %v1643_v11  ;;  %1504 = vmatmul.msk.f32.gmra.mxu2 %vm697_vm8, %v1643_v11 }
 0x146   :  { %1551 = vmatmul.msk.f32.gmra.mxu3 %vm994_vm7, %v1643_v11 }
 0x14a   :  { %v431_v2 = vpop.f32.mrf.mxu0  ;;  %v312_v15 = vpop.permute.xlu2 %311 }
 0x14b   :  { %v521_v16 = vadd.f32 %v520_v37, %v431_v2  ;;  %v666_v19 = vpop.permute.xlu0 %665  ;;  %v964_v26 = vpop.permute.xlu1 %963  ;;  %vm340_vm2 = vcmp.eq.s32.totalorder %v1819_v4, %v312_v15 }
 0x14c   :  { %vm700_vm1 = vcmp.eq.s32.totalorder %v1819_v4, %v666_v19  ;;  %vm998_vm3 = vcmp.eq.s32.totalorder %v1819_v4, %v964_v26  ;;  %v541_v0 = vpop.f32.mrf.mxu1 }
 0x14d   :  { %1435 = vmatmul.msk.f32.gmra.mxu0 %vm337_vm9, %v1643_v11  ;;  %1505 = vmatmul.msk.f32.gmra.mxu2 %vm698_vm11, %v1643_v11 }
 0x14e   :  { %1552 = vmatmul.msk.f32.gmra.mxu3 %vm995_vm10, %v1643_v11 }
 0x152   :  { %v434_v21 = vpop.f32.mrf.mxu0  ;;  %v315_v48 = vpop.permute.xlu2 %314 }
 0x153   :  { %v524_v57 = vadd.f32 %v523_v62, %v434_v21  ;;  %v669_v28 = vpop.permute.xlu0 %668  ;;  %v967_v41 = vpop.permute.xlu1 %966  ;;  %vm341_vm5 = vcmp.eq.s32.totalorder %v1819_v4, %v315_v48 }
 0x154   :  { %vm701_vm4 = vcmp.eq.s32.totalorder %v1819_v4, %v669_v28  ;;  %vm999_vm6 = vcmp.eq.s32.totalorder %v1819_v4, %v967_v41  ;;  %v544_v19 = vpop.f32.mrf.mxu1 }
 0x155   :  { %1436 = vmatmul.msk.f32.gmra.mxu0 %vm338_vm12, %v1643_v11  ;;  %1506 = vmatmul.msk.f32.gmra.mxu2 %vm699_vm14, %v1643_v11 }
 0x156   :  { %1553 = vmatmul.msk.f32.gmra.mxu3 %vm996_vm13, %v1643_v11 }
 0x158   :  { %v791_v24 = vpop.f32.mrf.mxu2 }
 0x159   :  { %v861_v27 = vadd.f32 %v791_v24, %v518_v10  ;;  %v1086_v20 = vpop.f32.mrf.mxu3 }
 0x15a   :  { %v1158_v29 = vadd.f32 %v1086_v20, %v860_v7  ;;  %v437_v30 = vpop.f32.mrf.mxu0  ;;  %v318_v59 = vpop.permute.xlu2 %317 }
 0x15b   :  { %v527_v31 = vadd.f32 %v526_v6, %v437_v30  ;;  %v672_v33 = vpop.permute.xlu0 %671  ;;  %v970_v56 = vpop.permute.xlu1 %969  ;;  %vm342_vm8 = vcmp.eq.s32.totalorder %v1819_v4, %v318_v59 }
 0x15c   :  { %v1185_v44 = vadd.f32 %v2225_v36, %v1158_v29  ;;  %vm702_vm7 = vcmp.eq.s32.totalorder %v1819_v4, %v672_v33  ;;  %vm1000_vm9 = vcmp.eq.s32.totalorder %v1819_v4, %v970_v56  ;;  %v547_v33 = vpop.f32.mrf.mxu1 }
 0x15d   :  { %1437 = vmatmul.msk.f32.gmra.mxu0 %vm339_vm15, %v1643_v11  ;;  %1507 = vmatmul.msk.f32.gmra.mxu2 %vm700_vm1, %v1643_v11  ;;  %vm1333_vm1 = vcmask 1042434  }
 0x15e   :  { %1554 = vmatmul.msk.f32.gmra.mxu3 %vm997_vm0, %v1643_v11  ;;  %vm1330_vm0 = vcmask 1041409  }
 0x160   :  { %v794_v38 = vpop.f32.mrf.mxu2 }
 0x161   :  { %v1089_v39 = vpop.f32.mrf.mxu3  ;;  %v862_v14 = vadd.f32 %v794_v38, %v521_v16 }
 0x162   :  { %v1159_v42 = vadd.f32 %v1089_v39, %v861_v27  ;;  %v440_v34 = vpop.f32.mrf.mxu0 }
 0x163   :  { %v530_v43 = vadd.f32 %v529_v17, %v440_v34  ;;  %v675_v58 = vpop.permute.xlu0 %674  ;;  %v973_v5 = vpop.permute.xlu1 %972 }
 0x164   :  { %v1186_v45 = vadd.f32 %v2230_v40, %v1159_v42  ;;  %vm703_vm10 = vcmp.eq.s32.totalorder %v1819_v4, %v675_v58  ;;  %vm1001_vm11 = vcmp.eq.s32.totalorder %v1819_v4, %v973_v5 }
 0x165   :  { %1438 = vmatmul.msk.f32.gmra.mxu0 %vm340_vm2, %v1643_v11  ;;  %1508 = vmatmul.msk.f32.gmra.mxu2 %vm701_vm4, %v1643_v11  ;;  %vm1336_vm2 = vcmask 1043459   ;;  %vm1342_vm4 = vcmask 1045509  }
 0x166   :  { %v1209_v50 = vmax.f32 %v1185_v44, %v1186_v45  ;;  %1555 = vmatmul.msk.f32.gmra.mxu3 %vm998_vm3, %v1643_v11  ;;  %vm1339_vm3 = vcmask 1044484  }
 0x168   :  { %v797_v61 = vpop.f32.mrf.mxu2 }
 0x169   :  { %v1092_v25 = vpop.f32.mrf.mxu3  ;;  %v863_v52 = vadd.f32 %v797_v61, %v524_v57 }
 0x16a   :  { %v1160_v23 = vadd.f32 %v1092_v25, %v862_v14  ;;  %v443_v54 = vpop.f32.mrf.mxu0 }
 0x16b   :  { %v533_v55 = vadd.f32 %v532_v22, %v443_v54  ;;  %v678_v7 = vpop.permute.xlu0 %677  ;;  %v976_v1 = vpop.permute.xlu1 %975 }
 0x16c   :  { %v1187_v49 = vadd.f32 %v2243_v51, %v1160_v23  ;;  %vm704_vm12 = vcmp.eq.s32.totalorder %v1819_v4, %v678_v7  ;;  %vm1002_vm13 = vcmp.eq.s32.totalorder %v1819_v4, %v976_v1 }
 0x16d   :  { %1439 = vmatmul.msk.f32.gmra.mxu0 %vm341_vm5, %v1643_v11  ;;  %1509 = vmatmul.msk.f32.gmra.mxu2 %vm702_vm7, %v1643_v11  ;;  %vm1345_vm5 = vcmask 1046534  }
 0x16e   :  { %v1210_v37 = vmax.f32 %v1209_v50, %v1187_v49  ;;  %1556 = vmatmul.msk.f32.gmra.mxu3 %vm999_vm6, %v1643_v11  ;;  %v2272_v50 = vld [vmem:[%s2324_s3] ss:$0 sm:$0xff]  ;;  %s1644_s3 = smov [#allocation5]   ;;  %vm1348_vm6 = vcmask 1047559  }
 0x16f   :  { %s1357_s16 = sshll.u32 %s1644_s3, 4  ;;  %s1358_s16 = int_to_ptr.vmem [resolvable:$true] %s1357_s16 }
 0x170   :  { %v800_v60 = vpop.f32.mrf.mxu2  ;;  %v1211_v8 = vrot.slane %v1210_v37, 4 }
 0x171   :  { %v1095_v35 = vpop.f32.mrf.mxu3  ;;  %v864_v62 = vadd.f32 %v800_v60, %v527_v31 }
 0x172   :  { %v1161_v63 = vadd.f32 %v1095_v35, %v863_v52  ;;  %v446_v47 = vpop.f32.mrf.mxu0  ;;  %v1212_v17 = vmax.f32 %v1210_v37, %v1211_v8 }
 0x173   :  { %v536_v3 = vadd.f32 %v535_v32, %v446_v47  ;;  %v681_v24 = vpop.permute.xlu0 %680  ;;  %v979_v41 = vpop.permute.xlu1 %978 }
 0x174   :  { %v1188_v2 = vadd.f32 %v2225_v36, %v1161_v63  ;;  %v1213_v21 = vrot.slane %v1212_v17, 2  ;;  %vm705_vm14 = vcmp.eq.s32.totalorder %v1819_v4, %v681_v24  ;;  %vm1003_vm15 = vcmp.eq.s32.totalorder %v1819_v4, %v979_v41  ;;  %v550_v4 = vpop.f32.mrf.mxu1 }
 0x175   :  { %1440 = vmatmul.msk.f32.gmra.mxu0 %vm342_vm8, %v1643_v11  ;;  %1510 = vmatmul.msk.f32.gmra.mxu2 %vm703_vm10, %v1643_v11 }
 0x176   :  { %1557 = vmatmul.msk.f32.gmra.mxu3 %vm1000_vm9, %v1643_v11  ;;  %v1214_v30 = vmax.f32 %v1212_v17, %v1213_v21 }
 0x178   :  { %v803_v6 = vpop.f32.mrf.mxu2  ;;  %v1215_v32 = vrot.slane %v1214_v30, 1 }
 0x179   :  { %v1098_v9 = vpop.f32.mrf.mxu3  ;;  %v865_v10 = vadd.f32 %v803_v6, %v530_v43 }
 0x17a   :  { %v1162_v53 = vadd.f32 %v1098_v9, %v864_v62  ;;  %v449_v12 = vpop.f32.mrf.mxu0  ;;  %v1216_v48 = vmax.f32 %v1214_v30, %v1215_v32 }
 0x17b   :  { %v539_v13 = vadd.f32 %v538_v46, %v449_v12  ;;  %v2280_v35 = vpop.permute.xlu0 %1296 }
 0x17c   :  { %v1189_v16 = vadd.f32 %v2230_v40, %v1162_v53  ;;  %v1277_v52 = vadd.f32 %v2272_v50, %v1216_v48  ;;  %v1298_v7 = vrot.slane %v2280_v35, 1  ;;  %v1299_v48 = vrot.slane %v2280_v35, 2 }
 0x17d   :  { %1511 = vmatmul.msk.f32.gmra.mxu2 %vm704_vm12, %v1643_v11 }
 0x17e   :  { %v1217_v18 = vmax.f32 %v1188_v2, %v1189_v16  ;;  %1558 = vmatmul.msk.f32.gmra.mxu3 %vm1001_vm11, %v1643_v11  ;;  %1571 = vtanh.f32 %v1277_v52  ;;  %v553_v2 = vpop.f32.mrf.mxu1 }
 0x180   :  { %v806_v57 = vpop.f32.mrf.mxu2 }
 0x181   :  { %v1101_v22 = vpop.f32.mrf.mxu3  ;;  %v866_v26 = vadd.f32 %v806_v57, %v533_v55 }
 0x182   :  { %v1163_v27 = vadd.f32 %v1101_v22, %v865_v10  ;;  %v452_v20 = vpop.f32.mrf.mxu0 }
 0x183   :  { %v542_v28 = vadd.f32 %v541_v0, %v452_v20 }
 0x184   :  { %v1190_v29 = vadd.f32 %v2243_v51, %v1163_v27  ;;  %v1572_v5 = vpop.eup %1571 }
 0x185   :  { %1512 = vmatmul.msk.f32.gmra.mxu2 %vm705_vm14, %v1643_v11  ;;  %v1313_v12 = vmul.f32 %v1572_v5, %v2280_v35 }
 0x186   :  { %v1218_v31 = vmax.f32 %v1217_v18, %v1190_v29  ;;  %1559 = vmatmul.msk.f32.gmra.mxu3 %vm1002_vm13, %v1643_v11  ;;  %v556_v30 = vpop.f32.mrf.mxu1 }
 0x188   :  { %v1219_v15 = vrot.slane %v1218_v31, 4  ;;  %v809_v38 = vpop.f32.mrf.mxu2 }
 0x189   :  { %v1104_v39 = vpop.f32.mrf.mxu3  ;;  %v867_v42 = vadd.f32 %v809_v38, %v536_v3 }
 0x18a   :  { %v1220_v14 = vmax.f32 %v1218_v31, %v1219_v15  ;;  %v1164_v34 = vadd.f32 %v1104_v39, %v866_v26  ;;  %v455_v43 = vpop.f32.mrf.mxu0 }
 0x18b   :  { %v545_v44 = vadd.f32 %v544_v19, %v455_v43 }
 0x18c   :  { %v1221_v45 = vrot.slane %v1220_v14, 2  ;;  %v1191_v59 = vadd.f32 %v2225_v36, %v1164_v34 }
 0x18e   :  { %v1222_v61 = vmax.f32 %v1220_v14, %v1221_v45  ;;  %1560 = vmatmul.msk.f32.gmra.mxu3 %vm1003_vm15, %v1643_v11 }
 0x190   :  { %v1223_v25 = vrot.slane %v1222_v61, 1  ;;  %v812_v23 = vpop.f32.mrf.mxu2 }
 0x191   :  { %v1107_v54 = vpop.f32.mrf.mxu3  ;;  %v868_v46 = vadd.f32 %v812_v23, %v539_v13 }
 0x192   :  { %v1224_v55 = vmax.f32 %v1222_v61, %v1223_v25  ;;  %v1165_v56 = vadd.f32 %v1107_v54, %v867_v42  ;;  %v458_v49 = vpop.f32.mrf.mxu0 }
 0x193   :  { %v548_v58 = vadd.f32 %v547_v33, %v458_v49 }
 0x194   :  { %v1278_v37 = vadd.f32 %v2272_v50, %v1224_v55  ;;  %v1192_v60 = vadd.f32 %v2230_v40, %v1165_v56 }
 0x196   :  { %1573 = vtanh.f32 %v1278_v37  ;;  %v1225_v11 = vmax.f32 %v1191_v59, %v1192_v60 }
 0x198   :  { %v815_v62 = vpop.f32.mrf.mxu2 }
 0x199   :  { %v1110_v63 = vpop.f32.mrf.mxu3  ;;  %v869_v47 = vadd.f32 %v815_v62, %v542_v28 }
 0x19a   :  { %v1166_v3 = vadd.f32 %v1110_v63, %v868_v46  ;;  %v461_v0 = vpop.f32.mrf.mxu0 }
 0x19b   :  { %v551_v8 = vadd.f32 %v550_v4, %v461_v0  ;;  %v559_v4 = vpop.f32.mrf.mxu1 }
 0x19c   :  { %v1574_v6 = vpop.eup %1573  ;;  %v1193_v9 = vadd.f32 %v2243_v51, %v1166_v3 }
 0x19d   :  { %v1314_v10 = vmul.f32 %v1574_v6, %v1298_v7 }
 0x19e   :  { %v1226_v53 = vmax.f32 %v1225_v11, %v1193_v9 }
 0x19f   :  { %v1329_v13 = vrot.slane %v1314_v10, 7 }
 0x1a0   :  { %v1227_v16 = vrot.slane %v1226_v53, 4  ;;  %v818_v17 = vpop.f32.mrf.mxu2 }
 0x1a1   :  { %v1113_v18 = vpop.f32.mrf.mxu3  ;;  %v1331_v19 = vsel %vm1330_vm0, %v1329_v13, %v1313_v12  ;;  %v870_v21 = vadd.f32 %v818_v17, %v545_v44  ;;  %v1300_v17 = vrot.slane %v2280_v35, 3 }
 0x1a2   :  { %v1228_v1 = vmax.f32 %v1226_v53, %v1227_v16  ;;  %v1167_v57 = vadd.f32 %v1113_v18, %v869_v47  ;;  %v464_v22 = vpop.f32.mrf.mxu0 }
 0x1a3   :  { %v554_v24 = vadd.f32 %v553_v2, %v464_v22  ;;  %v562_v53 = vpop.f32.mrf.mxu1 }
 0x1a4   :  { %v1229_v26 = vrot.slane %v1228_v1, 2  ;;  %v1194_v14 = vadd.f32 %v2225_v36, %v1167_v57 }
 0x1a6   :  { %v1230_v27 = vmax.f32 %v1228_v1, %v1229_v26 }
 0x1a8   :  { %v1231_v20 = vrot.slane %v1230_v27, 1  ;;  %v821_v28 = vpop.f32.mrf.mxu2 }
 0x1a9   :  { %v1116_v29 = vpop.f32.mrf.mxu3  ;;  %v871_v15 = vadd.f32 %v821_v28, %v548_v58 }
 0x1aa   :  { %v1232_v31 = vmax.f32 %v1230_v27, %v1231_v20  ;;  %v1168_v32 = vadd.f32 %v1116_v29, %v870_v21  ;;  %v467_v38 = vpop.f32.mrf.mxu0 }
 0x1ab   :  { %v557_v39 = vadd.f32 %v556_v30, %v467_v38 }
 0x1ac   :  { %v1279_v41 = vadd.f32 %v2272_v50, %v1232_v31  ;;  %v1195_v42 = vadd.f32 %v2230_v40, %v1168_v32 }
 0x1ae   :  { %1575 = vtanh.f32 %v1279_v41  ;;  %v1233_v34 = vmax.f32 %v1194_v14, %v1195_v42 }
 0x1b0   :  { %v824_v43 = vpop.f32.mrf.mxu2 }
 0x1b1   :  { %v1119_v44 = vpop.f32.mrf.mxu3  ;;  %v872_v33 = vadd.f32 %v824_v43, %v551_v8 }
 0x1b2   :  { %v1169_v45 = vadd.f32 %v1119_v44, %v871_v15  ;;  %v2290_v37 = vpop.f32.mrf.mxu0  ;;  %v1301_v44 = vrot.slane %v2280_v35, 4 }
 0x1b4   :  { %v1576_v61 = vpop.eup %1575  ;;  %v1196_v25 = vadd.f32 %v2243_v51, %v1169_v45 }
 0x1b5   :  { %v1315_v52 = vmul.f32 %v1576_v61, %v1299_v48 }
 0x1b6   :  { %v1234_v23 = vmax.f32 %v1233_v34, %v1196_v25 }
 0x1b7   :  { %v1332_v54 = vrot.slane %v1315_v52, 6 }
 0x1b8   :  { %v1235_v55 = vrot.slane %v1234_v23, 4  ;;  %v827_v46 = vpop.f32.mrf.mxu2 }
 0x1b9   :  { %v1122_v56 = vpop.f32.mrf.mxu3  ;;  %v1334_v49 = vsel %vm1333_vm1, %v1332_v54, %v1331_v19  ;;  %v873_v59 = vadd.f32 %v827_v46, %v554_v24  ;;  %v565_v24 = vpop.f32.mrf.mxu1 }
 0x1ba   :  { %v1236_v58 = vmax.f32 %v1234_v23, %v1235_v55  ;;  %v1170_v60 = vadd.f32 %v1122_v56, %v872_v33  ;;  %v473_v9 = vpop.f32.mrf.mxu0 }
 0x1bb   :  { %v563_v56 = vadd.f32 %v562_v53, %v473_v9 }
 0x1bc   :  { %v1237_v11 = vrot.slane %v1236_v58, 2  ;;  %v1197_v6 = vadd.f32 %v2225_v36, %v1170_v60  ;;  %v560_v60 = vadd.f32 %v559_v4, %v2290_v37 }
 0x1be   :  { %v1238_v62 = vmax.f32 %v1236_v58, %v1237_v11 }
 0x1c0   :  { %v1239_v63 = vrot.slane %v1238_v62, 1  ;;  %v830_v47 = vpop.f32.mrf.mxu2 }
 0x1c1   :  { %v1125_v3 = vpop.f32.mrf.mxu3  ;;  %v874_v5 = vadd.f32 %v830_v47, %v557_v39  ;;  %v568_v41 = vpop.f32.mrf.mxu1 }
 0x1c2   :  { %v1240_v0 = vmax.f32 %v1238_v62, %v1239_v63  ;;  %v1171_v7 = vadd.f32 %v1125_v3, %v873_v59  ;;  %v476_v21 = vpop.f32.mrf.mxu0 }
 0x1c3   :  { %v566_v11 = vadd.f32 %v565_v24, %v476_v21 }
 0x1c4   :  { %v1280_v8 = vadd.f32 %v2272_v50, %v1240_v0  ;;  %v1198_v10 = vadd.f32 %v2230_v40, %v1171_v7 }
 0x1c6   :  { %1577 = vtanh.f32 %v1280_v8  ;;  %v1241_v12 = vmax.f32 %v1197_v6, %v1198_v10 }
 0x1c8   :  { %v833_v13 = vpop.f32.mrf.mxu2 }
 0x1c9   :  { %v1128_v2 = vpop.f32.mrf.mxu3  ;;  %v571_v48 = vpop.f32.mrf.mxu1  ;;  %v875_v3 = vadd.f32 %v833_v13, %v560_v60 }
 0x1ca   :  { %v1172_v16 = vadd.f32 %v1128_v2, %v874_v5  ;;  %v479_v32 = vpop.f32.mrf.mxu0 }
 0x1cb   :  { %v569_v63 = vadd.f32 %v568_v41, %v479_v32 }
 0x1cc   :  { %v1578_v18 = vpop.eup %1577  ;;  %v1199_v19 = vadd.f32 %v2243_v51, %v1172_v16 }
 0x1cd   :  { %v1316_v1 = vmul.f32 %v1578_v18, %v1300_v17 }
 0x1ce   :  { %v1242_v57 = vmax.f32 %v1241_v12, %v1199_v19 }
 0x1cf   :  { %v1335_v22 = vrot.slane %v1316_v1, 5 }
 0x1d0   :  { %v1243_v26 = vrot.slane %v1242_v57, 4  ;;  %v836_v27 = vpop.f32.mrf.mxu2 }
 0x1d1   :  { %v1131_v20 = vpop.f32.mrf.mxu3  ;;  %v1337_v28 = vsel %vm1336_vm2, %v1335_v22, %v1334_v49  ;;  %v574_v46 = vpop.f32.mrf.mxu1  ;;  %v876_v62 = vadd.f32 %v836_v27, %v563_v56 }
 0x1d2   :  { %v1244_v29 = vmax.f32 %v1242_v57, %v1243_v26  ;;  %v482_v33 = vpop.f32.mrf.mxu0  ;;  %v1173_v6 = vadd.f32 %v1131_v20, %v875_v3 }
 0x1d3   :  { %v572_v49 = vadd.f32 %v571_v48, %v482_v33 }
 0x1d4   :  { %v1245_v30 = vrot.slane %v1244_v29, 2  ;;  %v1200_v19 = vadd.f32 %v2225_v36, %v1173_v6 }
 0x1d6   :  { %v1246_v31 = vmax.f32 %v1244_v29, %v1245_v30 }
 0x1d8   :  { %v1247_v15 = vrot.slane %v1246_v31, 1  ;;  %v839_v38 = vpop.f32.mrf.mxu2 }
 0x1d9   :  { %v1134_v39 = vpop.f32.mrf.mxu3  ;;  %v877_v0 = vadd.f32 %v839_v38, %v566_v11  ;;  %v577_v9 = vpop.f32.mrf.mxu1 }
 0x1da   :  { %v1248_v14 = vmax.f32 %v1246_v31, %v1247_v15  ;;  %v485_v55 = vpop.f32.mrf.mxu0  ;;  %v1174_v5 = vadd.f32 %v1134_v39, %v876_v62 }
 0x1db   :  { %v575_v10 = vadd.f32 %v574_v46, %v485_v55 }
 0x1dc   :  { %v1281_v42 = vadd.f32 %v2272_v50, %v1248_v14  ;;  %v1201_v53 = vadd.f32 %v2230_v40, %v1174_v5 }
 0x1de   :  { %1579 = vtanh.f32 %v1281_v42  ;;  %v1249_v57 = vmax.f32 %v1200_v19, %v1201_v53  ;;  %v1303_v53 = vrot.slane %v2280_v35, 6 }
 0x1e0   :  { %v842_v34 = vpop.f32.mrf.mxu2 }
 0x1e1   :  { %v1137_v43 = vpop.f32.mrf.mxu3  ;;  %v878_v7 = vadd.f32 %v842_v34, %v569_v63  ;;  %v580_v30 = vpop.f32.mrf.mxu1 }
 0x1e2   :  { %v1175_v12 = vadd.f32 %v1137_v43, %v877_v0  ;;  %v488_v2 = vpop.f32.mrf.mxu0 }
 0x1e3   :  { %v578_v42 = vadd.f32 %v577_v9, %v488_v2 }
 0x1e4   :  { %v1580_v45 = vpop.eup %1579  ;;  %v1202_v13 = vadd.f32 %v2243_v51, %v1175_v12 }
 0x1e5   :  { %v1317_v61 = vmul.f32 %v1580_v45, %v1301_v44 }
 0x1e6   :  { %v1250_v26 = vmax.f32 %v1249_v57, %v1202_v13 }
 0x1e7   :  { %v1338_v25 = vrot.slane %v1317_v61, 4 }
 0x1e8   :  { %v845_v52 = vpop.f32.mrf.mxu2  ;;  %v1251_v29 = vrot.slane %v1250_v26, 4 }
 0x1e9   :  { %v1140_v23 = vpop.f32.mrf.mxu3  ;;  %v2299_v54 = vsel %vm1339_vm3, %v1338_v25, %v1337_v28  ;;  %v879_v47 = vadd.f32 %v845_v52, %v572_v49  ;;  %v583_v48 = vpop.f32.mrf.mxu1 }
 0x1ea   :  { %v1176_v16 = vadd.f32 %v1140_v23, %v878_v7  ;;  %v491_v20 = vpop.f32.mrf.mxu0  ;;  %v1252_v32 = vmax.f32 %v1250_v26, %v1251_v29 }
 0x1eb   :  { %v581_v39 = vadd.f32 %v580_v30, %v491_v20 }
 0x1ec   :  { %v1203_v21 = vadd.f32 %v2225_v36, %v1176_v16  ;;  %v1253_v14 = vrot.slane %v1252_v32, 2 }
 0x1ee   :  { %v1254_v25 = vmax.f32 %v1252_v32, %v1253_v14 }
 0x1f0   :  { %v848_v58 = vpop.f32.mrf.mxu2 }
 0x1f1   :  { %v1143_v59 = vpop.f32.mrf.mxu3  ;;  %v880_v17 = vadd.f32 %v848_v58, %v575_v10  ;;  %v1255_v58 = vrot.slane %v1254_v25, 1 }
 0x1f2   :  { %v1177_v8 = vadd.f32 %v1143_v59, %v879_v47  ;;  %v494_v43 = vpop.f32.mrf.mxu0 }
 0x1f3   :  { %v584_v52 = vadd.f32 %v583_v48, %v494_v43  ;;  %v1256_v47 = vmax.f32 %v1254_v25, %v1255_v58 }
 0x1f4   :  { %v1204_v37 = vadd.f32 %v2230_v40, %v1177_v8 }
 0x1f5   :  { %v1282_v7 = vadd.f32 %v2272_v50, %v1256_v47 }
 0x1f6   :  { %v1257_v24 = vmax.f32 %v1203_v21, %v1204_v37 }
 0x1f7   :  { %1581 = vtanh.f32 %v1282_v7 }
 0x1f8   :  { %v851_v4 = vpop.f32.mrf.mxu2 }
 0x1f9   :  { %v1146_v18 = vpop.f32.mrf.mxu3  ;;  %v881_v33 = vadd.f32 %v851_v4, %v578_v42  ;;  %v1304_v4 = vrot.slane %v2280_v35, 7 }
 0x1fa   :  { %v1178_v1 = vadd.f32 %v1146_v18, %v880_v17 }
 0x1fc   :  { %v1205_v22 = vadd.f32 %v2243_v51, %v1178_v1 }
 0x1fd   :  { %v1582_v2 = vpop.eup %1581 }
 0x1fe   :  { %v1258_v27 = vmax.f32 %v1257_v24, %v1205_v22 }
 0x200   :  { %v1259_v31 = vrot.slane %v1258_v27, 4  ;;  %v854_v15 = vpop.f32.mrf.mxu2 }
 0x201   :  { %v1149_v28 = vpop.f32.mrf.mxu3  ;;  %v882_v34 = vadd.f32 %v854_v15, %v581_v39 }
 0x202   :  { %v1260_v38 = vmax.f32 %v1258_v27, %v1259_v31  ;;  %v1179_v23 = vadd.f32 %v1149_v28, %v881_v33 }
 0x204   :  { %v1261_v44 = vrot.slane %v1260_v38, 2  ;;  %v1206_v59 = vadd.f32 %v2225_v36, %v1179_v23 }
 0x206   :  { %v1262_v55 = vmax.f32 %v1260_v38, %v1261_v44 }
 0x208   :  { %v857_v61 = vpop.f32.mrf.mxu2  ;;  %v1263_v11 = vrot.slane %v1262_v55, 1 }
 0x209   :  { %v1152_v41 = vpop.f32.mrf.mxu3  ;;  %v883_v46 = vadd.f32 %v857_v61, %v584_v52 }
 0x20a   :  { %v1180_v45 = vadd.f32 %v1152_v41, %v882_v34  ;;  %v1264_v0 = vmax.f32 %v1262_v55, %v1263_v11 }
 0x20c   :  { %v1207_v56 = vadd.f32 %v2230_v40, %v1180_v45  ;;  %v1283_v6 = vadd.f32 %v2272_v50, %v1264_v0 }
 0x20e   :  { %v1265_v62 = vmax.f32 %v1206_v59, %v1207_v56  ;;  %1583 = vtanh.f32 %v1283_v6 }
 0x211   :  { %v1155_v49 = vpop.f32.mrf.mxu3 }
 0x212   :  { %v1181_v60 = vadd.f32 %v1155_v49, %v883_v46 }
 0x214   :  { %v1208_v63 = vadd.f32 %v2243_v51, %v1181_v60  ;;  %v1584_v9 = vpop.eup %1583  ;;  %v1302_v51 = vrot.slane %v2280_v35, 5 }
 0x215   :  { %v1319_v37 = vmul.f32 %v1584_v9, %v1303_v53 }
 0x216   :  { %v1266_v3 = vmax.f32 %v1265_v62, %v1208_v63  ;;  %v1318_v17 = vmul.f32 %v1582_v2, %v1302_v51 }
 0x217   :  { %v1344_v13 = vrot.slane %v1319_v37, 2 }
 0x218   :  { %v1267_v5 = vrot.slane %v1266_v3, 4  ;;  %v1341_v18 = vrot.slane %v1318_v17, 3 }
 0x21a   :  { %v1268_v8 = vmax.f32 %v1266_v3, %v1267_v5 }
 0x21c   :  { %v1269_v10 = vrot.slane %v1268_v8, 2 }
 0x21e   :  { %v1270_v40 = vmax.f32 %v1268_v8, %v1269_v10 }
 0x220   :  { %v1271_v12 = vrot.slane %v1270_v40, 1 }
 0x222   :  { %v1272_v36 = vmax.f32 %v1270_v40, %v1271_v12 }
 0x224   :  { %v1284_v16 = vadd.f32 %v2272_v50, %v1272_v36  ;;  %v1343_v50 = vsel %vm1342_vm4, %v1341_v18, %v2299_v54 }
 0x225   :  { %v1346_v57 = vsel %vm1345_vm5, %v1344_v13, %v1343_v50 }
 0x226   :  { %1585 = vtanh.f32 %v1284_v16 }
 0x22c   :  { %v1586_v19 = vpop.eup %1585 }
 0x22d   :  { %v1320_v1 = vmul.f32 %v1586_v19, %v1304_v4 }
 0x22f   :  { %v1347_v21 = vrot.slane %v1320_v1, 1 }
 0x231   :  { %v1349_v35 = vsel %vm1348_vm6, %v1347_v21, %v1346_v57 }
 0x232   :  { %1351 = vst [vmem:[#allocation5] sm:$0xff] %v1349_v35 }
 0x233   :  { %1362 = dma.vmem_to_hbm [thread:$0]  %s1358_s16, 128, %s1360_s19, [#allocation4]  }
 0x234   :  { %1637 = dma.done.wait [#allocation4], 128  }
 0x235   :  { %1638 = vsyncadd [#allocation4], 4294967168 }
 0x236   :  { %1367 = vsyncpa [#allocation3], 1 }
 0x237   :  { %1368 = vsyncpa [#allocation4], 1 }

</bundles_post_ra>
